<compile_context>
chip_gen: v5e
topology: v5e:2x2
jax: 0.10.0
libtpu: 0.0.40
codegen_flags: <defaults>
</compile_context>

<pallas_src>
import functools
import math

import jax
import jax.numpy as jnp
import numpy as np
from jax import lax
from jax.experimental import pallas as pl
from jax.experimental.pallas import tpu as pltpu


_PAD_MODE = {"constant": "constant", "reflect": "reflect",
             "replicate": "edge", "circular": "wrap"}


def get_laplacian_kernel2d(kernel_size: int, normalized: bool) -> np.ndarray:
    """kornia.filters.get_laplacian_kernel2d: all ones, center = 1 - k**2."""
    k = np.ones((kernel_size, kernel_size), dtype=np.float32)
    mid = kernel_size // 2
    k[mid, mid] = 1.0 - float(kernel_size**2)
    if normalized:
        k = k / np.abs(k).sum()
    return k


def _divisors(n):
    return sorted({d for i in range(1, int(math.isqrt(n)) + 1) if n % i == 0
                   for d in (i, n // i)})


def _window_sum(x, k, axis):
    """Sliding-window sum of length k along `axis` via a log2 doubling tree.

    x has size N + k - 1 along `axis`; returns size N.  For k=11 this is
    s2 = s1 + shift(s1,1); s4 = s2 + shift(s2,2); s8 = s4 + shift(s4,4);
    out = s8 + shift(s2,8) + shift(s1,10)  -> 5 adds instead of 10.
    """
    n_out = x.shape[axis] - (k - 1)
    pows = {1: x}
    p = 1
    while 2 * p <= k:
        s = pows[p]
        n = s.shape[axis]
        pows[2 * p] = (lax.slice_in_dim(s, 0, n - p, axis=axis)
                       + lax.slice_in_dim(s, p, n, axis=axis))
        p *= 2
    out = None
    off = 0
    for p in sorted(pows, reverse=True):
        if k & p:
            piece = lax.slice_in_dim(pows[p], off, off + n_out, axis=axis)
            out = piece if out is None else out + piece
            off += p
    return out


def _pad_cols(v, pad, mode):
    """Border-mode halo of `pad` columns on both sides of axis=2 (in-kernel)."""
    if pad == 0:
        return v
    W = v.shape[2]
    col = lambda i: lax.slice_in_dim(v, i, i + 1, axis=2)
    if mode == "reflect":          # col -i -> i ; col W-1+i -> W-1-i
        left = [col(i) for i in range(pad, 0, -1)]
        right = [col(W - 2 - i) for i in range(pad)]
    elif mode == "edge":
        left = [col(0)] * pad
        right = [col(W - 1)] * pad
    elif mode == "wrap":
        left = [lax.slice_in_dim(v, W - pad, W, axis=2)]
        right = [lax.slice_in_dim(v, 0, pad, axis=2)]
    else:                          # constant -> zeros
        z = jnp.zeros(v.shape[:2] + (pad,), v.dtype)
        left, right = [z], [z]
    return jnp.concatenate(left + [v] + right, axis=2)


def _lap_partial_kernel(x_ref, halo_ref, out_ref, *, ksize, mode):
    """One (CB, TILE_H, W) tile: separable Laplacian + (sum, sum_sq) partials."""
    pad = (ksize - 1) // 2
    xt = x_ref[...].astype(jnp.float32)               # (CB, TH, W)

    # Stitch the pre-gathered row halo (reflect/replicate/... already resolved
    # in the gather indices) so the vertical pass never leaves the tile.
    hal = halo_ref[...].astype(jnp.float32)[:, 0]     # (CB, 2*pad, W)
    xh = jnp.concatenate([hal[:, :pad, :], xt, hal[:, pad:, :]], axis=1)

    # Separable k x k box sum: vertical pass, in-kernel column halo, horizontal.
    v = _window_sum(xh, ksize, axis=1)                # (CB, TH, W)
    h = _window_sum(_pad_cols(v, pad, mode), ksize, axis=2)   # (CB, TH, W)

    # Laplacian taps are all 1 except center = 1 - k^2; the box sum already
    # contributed +1 * center, so subtract k^2 * center (constant baked in).
    lap = h - jnp.float32(ksize * ksize) * xt

    # Single-pass variance partials for this tile (f32 accumulation; Laplacian
    # response has ~zero mean so cancellation is benign at these sizes).
    s = jnp.sum(lap).reshape(1, 1, 1)
    sq = jnp.sum(lap * lap).reshape(1, 1, 1)
    out_ref[...] = jnp.concatenate([s, sq], axis=2)   # (1, 1, 2)


def _halo_row_indices(H, tile_h, pad, mode):
    """Static source-row indices (and constant-mode validity) for each tile's
    top/bottom halo rows, with the border mode applied at the image edges."""
    NH = H // tile_h
    idx = np.zeros((NH, 2 * pad), np.int64)
    valid = np.ones((NH, 2 * pad), np.float32)
    for h in range(NH):
        r0 = h * tile_h
        for j in range(pad):
            for slot, r in ((j, r0 - pad + j), (pad + j, r0 + tile_h + j)):
                if 0 <= r < H:
                    idx[h, slot] = r
                elif mode == "reflect":
                    idx[h, slot] = -r if r < 0 else 2 * H - 2 - r
                elif mode == "edge":
                    idx[h, slot] = 0 if r < 0 else H - 1
                elif mode == "wrap":
                    idx[h, slot] = r % H
                else:  # constant
                    idx[h, slot] = 0
                    valid[h, slot] = 0.0
    return idx.reshape(-1), valid


def laplacian_variance(x, kernel_size=11, border_type="reflect",
                       normalized=False, tile_h=None, channels_per_block=None):
    """Forward of Laplacian(kernel_size, border_type, normalized,
    return_variance=True): unbiased variance of the Laplacian-filtered image."""
    assert x.ndim == 4
    assert kernel_size % 2 == 1 and kernel_size >= 3, "kernel_size must be odd >= 3"
    B, C, H, W = x.shape
    k = kernel_size
    pad = (k - 1) // 2
    assert pad < H and pad < W, "border padding needs pad < H and pad < W"
    mode = _PAD_MODE[border_type]

    BC = B * C
    itemsize = jnp.dtype(x.dtype).itemsize

    # --- per-generation VMEM budget & tile selection ---------------------------
    try:
        vmem_cap = int(pltpu.get_tpu_info().vmem_capacity_bytes)
    except Exception:
        vmem_cap = 64 * 1024 * 1024                  # conservative (v7x per-TC)
    vmem_limit = min(int(vmem_cap * 0.9), 100 * 1024 * 1024)
    budget = int(vmem_limit * 0.6)                   # headroom for f32 temporaries

    def need_bytes(cb, th):
        tile_in = cb * th * W * itemsize
        halo_in = cb * 2 * pad * W * itemsize
        work = cb * (th + 2 * pad) * (W + 2 * pad) * 4 * 5   # f32 intermediates
        return 2 * (tile_in + halo_in) + work                # 2x: double-buffered

    if tile_h is None:
        cand = [d for d in _divisors(H) if d % 8 == 0 or d == H]
        fits = [d for d in cand if need_bytes(1, d) <= budget]
        tile_h = max(fits) if fits else min(cand)
    assert H % tile_h == 0 and (tile_h % 8 == 0 or tile_h == H)
    NH = H // tile_h

    if channels_per_block is None:
        if NH == 1:
            fits = [d for d in _divisors(BC) if need_bytes(d, tile_h) <= budget]
            channels_per_block = max(fits) if fits else 1
        else:
            channels_per_block = 1
    assert BC % channels_per_block == 0
    CB = channels_per_block
    NB = BC // CB

    # --- inputs: original dtype, unpadded; only the thin per-tile row halos are
    #     gathered host-side (no full padded-image HBM round trip) ---------------
    xr = x.reshape(BC, H, W)
    idx, valid = _halo_row_indices(H, tile_h, pad, mode)
    halos = jnp.take(xr, jnp.asarray(idx, dtype=jnp.int32), axis=1)
    halos = halos.reshape(BC, NH, 2 * pad, W)
    if mode == "constant":
        halos = halos * jnp.asarray(valid.reshape(1, NH, 2 * pad, 1),
                                    dtype=halos.dtype)

    partials = pl.pallas_call(
        functools.partial(_lap_partial_kernel, ksize=k, mode=mode),
        out_shape=jax.ShapeDtypeStruct((NB * NH, 1, 2), jnp.float32),
        grid=(NB, NH),
        in_specs=[pl.BlockSpec((CB, tile_h, W), lambda b, h: (b, h, 0)),
                  pl.BlockSpec((CB, 1, 2 * pad, W), lambda b, h: (b, h, 0, 0))],
        out_specs=pl.BlockSpec((1, 1, 2), lambda b, h: (b * NH + h, 0, 0)),
        compiler_params=pltpu.CompilerParams(
            dimension_semantics=("parallel", "parallel"),
            vmem_limit_bytes=vmem_limit),
    )(xr, halos)

    # Tiny final reduction + unbiased variance (ddof=1, torch.var default).
    n = jnp.float32(BC * H * W)
    total = jnp.sum(partials[:, 0, 0])
    total_sq = jnp.sum(partials[:, 0, 1])
    var = (total_sq - total * total / n) / (n - 1.0)
    if normalized:
        # kornia scales the kernel by 1/|k|_1; variance scales by its square.
        scale = 1.0 / float(np.abs(get_laplacian_kernel2d(k, False)).sum())
        var = var * (scale * scale)
    return var


def _reference(x, kernel_size=11, border_type="reflect", normalized=False):
    """Pure-JAX reference (direct k*k-tap conv, two-pass variance)."""
    B, C, H, W = x.shape
    pad = (kernel_size - 1) // 2
    mode = _PAD_MODE[border_type]
    w = get_laplacian_kernel2d(kernel_size, normalized)
    xp = jnp.pad(x.astype(jnp.float32).reshape(B * C, H, W),
                 ((0, 0), (pad, pad), (pad, pad)), mode=mode)
    acc = jnp.zeros((B * C, H, W), jnp.float32)
    for ky in range(kernel_size):
        for kx in range(kernel_size):
            acc = acc + float(w[ky, kx]) * xp[:, ky:ky + H, kx:kx + W]
    return jnp.var(acc, ddof=1)


if __name__ == "__main__":
    key = jax.random.PRNGKey(0)
    k1, k2, k3 = jax.random.split(key, 3)

    # Main case from the module spec: (B, C, H, W) = (2, 4, 16, 16).
    x = jax.random.normal(k1, (2, 4, 16, 16), dtype=jnp.float32)
    out = jax.block_until_ready(laplacian_variance(x, kernel_size=11,
                                                   border_type="reflect",
                                                   normalized=False))
    ref = jax.block_until_ready(_reference(x))
    np.testing.assert_allclose(np.asarray(out), np.asarray(ref),
                               rtol=1e-3, atol=1e-4)

    # Force the H-tiled path (row halos across tile boundaries, 2x3 grid).
    x2 = jax.random.normal(k2, (1, 2, 48, 32), dtype=jnp.float32)
    out2 = jax.block_until_ready(laplacian_variance(x2, tile_h=16))
    ref2 = jax.block_until_ready(_reference(x2))
    np.testing.assert_allclose(np.asarray(out2), np.asarray(ref2),
                               rtol=1e-3, atol=1e-4)

    # bf16 input stays bf16 in HBM; the f32 cast happens inside the kernel.
    x3 = jax.random.normal(k3, (1, 1, 24, 24), dtype=jnp.bfloat16)
    out3 = jax.block_until_ready(laplacian_variance(x3))
    ref3 = jax.block_until_ready(_reference(x3))
    np.testing.assert_allclose(np.asarray(out3), np.asarray(ref3),
                               rtol=2e-2, atol=1e-2)

    print("KERNEL_OK")
</pallas_src>

<mosaic_0001>
module attributes {stable_mosaic.version = 11 : i64} {
  func.func @_lap_partial_kernel(%arg0: i32, %arg1: i32, %arg2: memref<8x16x16xf32, #tpu.memory_space<vmem>>, %arg3: memref<8x1x10x16xf32, #tpu.memory_space<vmem>>, %arg4: memref<1x1x2xf32, #tpu.memory_space<vmem>>) attributes {dimension_semantics = [#tpu.dimension_semantics<parallel>, #tpu.dimension_semantics<parallel>], iteration_bounds = array<i64: 1, 1>, scalar_prefetch = 0 : i64, scratch_operands = 0 : i64, tpu.core_type = #tpu.core_type<tc>, window_params = [{transform_indices = @transform_0, window_bounds = array<i64: 8, 16, 16>}, {transform_indices = @transform_1, window_bounds = array<i64: 8, 1, 10, 16>}, {transform_indices = @transform_2, window_bounds = array<i64: 1, 1, 2>}]} {
    %c0 = arith.constant 0 : index
    %c0_0 = arith.constant 0 : index
    %c0_1 = arith.constant 0 : index
    %0 = vector.load %arg2[%c0, %c0_0, %c0_1] : memref<8x16x16xf32, #tpu.memory_space<vmem>>, vector<8x16x16xf32>
    %c0_2 = arith.constant 0 : index
    %c0_3 = arith.constant 0 : index
    %c0_4 = arith.constant 0 : index
    %c0_5 = arith.constant 0 : index
    %1 = vector.load %arg3[%c0_2, %c0_3, %c0_4, %c0_5] : memref<8x1x10x16xf32, #tpu.memory_space<vmem>>, vector<8x1x10x16xf32>
    %2 = vector.shape_cast %1 : vector<8x1x10x16xf32> to vector<8x10x16xf32>
    %3 = vector.extract_strided_slice %2 {offsets = [0, 0, 0], sizes = [8, 5, 16], strides = [1, 1, 1]} : vector<8x10x16xf32> to vector<8x5x16xf32>
    %4 = vector.extract_strided_slice %2 {offsets = [0, 5, 0], sizes = [8, 5, 16], strides = [1, 1, 1]} : vector<8x10x16xf32> to vector<8x5x16xf32>
    %5 = tpu.concatenate %3, %0, %4 in 1 : vector<8x5x16xf32>, vector<8x16x16xf32>, vector<8x5x16xf32> -> vector<8x26x16xf32>
    %6 = vector.extract_strided_slice %5 {offsets = [0, 0, 0], sizes = [8, 25, 16], strides = [1, 1, 1]} : vector<8x26x16xf32> to vector<8x25x16xf32>
    %7 = vector.extract_strided_slice %5 {offsets = [0, 1, 0], sizes = [8, 25, 16], strides = [1, 1, 1]} : vector<8x26x16xf32> to vector<8x25x16xf32>
    %8 = arith.addf %6, %7 : vector<8x25x16xf32>
    %9 = vector.extract_strided_slice %8 {offsets = [0, 0, 0], sizes = [8, 23, 16], strides = [1, 1, 1]} : vector<8x25x16xf32> to vector<8x23x16xf32>
    %10 = vector.extract_strided_slice %8 {offsets = [0, 2, 0], sizes = [8, 23, 16], strides = [1, 1, 1]} : vector<8x25x16xf32> to vector<8x23x16xf32>
    %11 = arith.addf %9, %10 : vector<8x23x16xf32>
    %12 = vector.extract_strided_slice %11 {offsets = [0, 0, 0], sizes = [8, 19, 16], strides = [1, 1, 1]} : vector<8x23x16xf32> to vector<8x19x16xf32>
    %13 = vector.extract_strided_slice %11 {offsets = [0, 4, 0], sizes = [8, 19, 16], strides = [1, 1, 1]} : vector<8x23x16xf32> to vector<8x19x16xf32>
    %14 = arith.addf %12, %13 : vector<8x19x16xf32>
    %15 = vector.extract_strided_slice %14 {offsets = [0, 0, 0], sizes = [8, 16, 16], strides = [1, 1, 1]} : vector<8x19x16xf32> to vector<8x16x16xf32>
    %16 = vector.extract_strided_slice %8 {offsets = [0, 8, 0], sizes = [8, 16, 16], strides = [1, 1, 1]} : vector<8x25x16xf32> to vector<8x16x16xf32>
    %17 = arith.addf %15, %16 : vector<8x16x16xf32>
    %18 = vector.extract_strided_slice %5 {offsets = [0, 10, 0], sizes = [8, 16, 16], strides = [1, 1, 1]} : vector<8x26x16xf32> to vector<8x16x16xf32>
    %19 = arith.addf %17, %18 : vector<8x16x16xf32>
    %20 = vector.extract_strided_slice %19 {offsets = [0, 0, 5], sizes = [8, 16, 1], strides = [1, 1, 1]} : vector<8x16x16xf32> to vector<8x16x1xf32>
    %21 = vector.extract_strided_slice %19 {offsets = [0, 0, 4], sizes = [8, 16, 1], strides = [1, 1, 1]} : vector<8x16x16xf32> to vector<8x16x1xf32>
    %22 = vector.extract_strided_slice %19 {offsets = [0, 0, 3], sizes = [8, 16, 1], strides = [1, 1, 1]} : vector<8x16x16xf32> to vector<8x16x1xf32>
    %23 = vector.extract_strided_slice %19 {offsets = [0, 0, 2], sizes = [8, 16, 1], strides = [1, 1, 1]} : vector<8x16x16xf32> to vector<8x16x1xf32>
    %24 = vector.extract_strided_slice %19 {offsets = [0, 0, 1], sizes = [8, 16, 1], strides = [1, 1, 1]} : vector<8x16x16xf32> to vector<8x16x1xf32>
    %25 = vector.extract_strided_slice %19 {offsets = [0, 0, 14], sizes = [8, 16, 1], strides = [1, 1, 1]} : vector<8x16x16xf32> to vector<8x16x1xf32>
    %26 = vector.extract_strided_slice %19 {offsets = [0, 0, 13], sizes = [8, 16, 1], strides = [1, 1, 1]} : vector<8x16x16xf32> to vector<8x16x1xf32>
    %27 = vector.extract_strided_slice %19 {offsets = [0, 0, 12], sizes = [8, 16, 1], strides = [1, 1, 1]} : vector<8x16x16xf32> to vector<8x16x1xf32>
    %28 = vector.extract_strided_slice %19 {offsets = [0, 0, 11], sizes = [8, 16, 1], strides = [1, 1, 1]} : vector<8x16x16xf32> to vector<8x16x1xf32>
    %29 = vector.extract_strided_slice %19 {offsets = [0, 0, 10], sizes = [8, 16, 1], strides = [1, 1, 1]} : vector<8x16x16xf32> to vector<8x16x1xf32>
    %30 = tpu.concatenate %20, %21, %22, %23, %24, %19, %25, %26, %27, %28, %29 in 2 : vector<8x16x1xf32>, vector<8x16x1xf32>, vector<8x16x1xf32>, vector<8x16x1xf32>, vector<8x16x1xf32>, vector<8x16x16xf32>, vector<8x16x1xf32>, vector<8x16x1xf32>, vector<8x16x1xf32>, vector<8x16x1xf32>, vector<8x16x1xf32> -> vector<8x16x26xf32>
    %31 = vector.extract_strided_slice %30 {offsets = [0, 0, 0], sizes = [8, 16, 25], strides = [1, 1, 1]} : vector<8x16x26xf32> to vector<8x16x25xf32>
    %32 = vector.extract_strided_slice %30 {offsets = [0, 0, 1], sizes = [8, 16, 25], strides = [1, 1, 1]} : vector<8x16x26xf32> to vector<8x16x25xf32>
    %33 = arith.addf %31, %32 : vector<8x16x25xf32>
    %34 = vector.extract_strided_slice %33 {offsets = [0, 0, 0], sizes = [8, 16, 23], strides = [1, 1, 1]} : vector<8x16x25xf32> to vector<8x16x23xf32>
    %35 = vector.extract_strided_slice %33 {offsets = [0, 0, 2], sizes = [8, 16, 23], strides = [1, 1, 1]} : vector<8x16x25xf32> to vector<8x16x23xf32>
    %36 = arith.addf %34, %35 : vector<8x16x23xf32>
    %37 = vector.extract_strided_slice %36 {offsets = [0, 0, 0], sizes = [8, 16, 19], strides = [1, 1, 1]} : vector<8x16x23xf32> to vector<8x16x19xf32>
    %38 = vector.extract_strided_slice %36 {offsets = [0, 0, 4], sizes = [8, 16, 19], strides = [1, 1, 1]} : vector<8x16x23xf32> to vector<8x16x19xf32>
    %39 = arith.addf %37, %38 : vector<8x16x19xf32>
    %40 = vector.extract_strided_slice %39 {offsets = [0, 0, 0], sizes = [8, 16, 16], strides = [1, 1, 1]} : vector<8x16x19xf32> to vector<8x16x16xf32>
    %41 = vector.extract_strided_slice %33 {offsets = [0, 0, 8], sizes = [8, 16, 16], strides = [1, 1, 1]} : vector<8x16x25xf32> to vector<8x16x16xf32>
    %42 = arith.addf %40, %41 : vector<8x16x16xf32>
    %43 = vector.extract_strided_slice %30 {offsets = [0, 0, 10], sizes = [8, 16, 16], strides = [1, 1, 1]} : vector<8x16x26xf32> to vector<8x16x16xf32>
    %44 = arith.addf %42, %43 : vector<8x16x16xf32>
    %cst = arith.constant 1.210000e+02 : f32
    %45 = vector.broadcast %cst : f32 to vector<8x16x16xf32>
    %46 = arith.mulf %45, %0 : vector<8x16x16xf32>
    %47 = arith.subf %44, %46 : vector<8x16x16xf32>
    %48 = vector.shape_cast %47 : vector<8x16x16xf32> to vector<1x8x16x16xf32>
    %cst_6 = arith.constant dense<0.000000e+00> : vector<1xf32>
    %49 = vector.multi_reduction <add>, %48, %cst_6 [1, 2, 3] : vector<1x8x16x16xf32> to vector<1xf32>
    %50 = vector.shape_cast %49 : vector<1xf32> to vector<1x1x1x1xf32>
    %51 = vector.extract %50[0, 0, 0, 0] : f32 from vector<1x1x1x1xf32>
    %52 = vector.broadcast %51 : f32 to vector<1x1x1xf32>
    %53 = arith.mulf %47, %47 : vector<8x16x16xf32>
    %54 = vector.shape_cast %53 : vector<8x16x16xf32> to vector<1x8x16x16xf32>
    %cst_7 = arith.constant dense<0.000000e+00> : vector<1xf32>
    %55 = vector.multi_reduction <add>, %54, %cst_7 [1, 2, 3] : vector<1x8x16x16xf32> to vector<1xf32>
    %56 = vector.shape_cast %55 : vector<1xf32> to vector<1x1x1x1xf32>
    %57 = vector.extract %56[0, 0, 0, 0] : f32 from vector<1x1x1x1xf32>
    %58 = vector.broadcast %57 : f32 to vector<1x1x1xf32>
    %59 = tpu.concatenate %52, %58 in 2 : vector<1x1x1xf32>, vector<1x1x1xf32> -> vector<1x1x2xf32>
    %c0_8 = arith.constant 0 : index
    %c0_9 = arith.constant 0 : index
    %c0_10 = arith.constant 0 : index
    %60 = vector.load %arg4[%c0_8, %c0_9, %c0_10] : memref<1x1x2xf32, #tpu.memory_space<vmem>>, vector<1x1x2xf32>
    tpu.vector_store %arg4[%c0_8, %c0_9, %c0_10], %59 {strides = array<i32>} : memref<1x1x2xf32, #tpu.memory_space<vmem>>, vector<1x1x2xf32>,
    return
  }
  func.func @transform_0(%arg0: i32, %arg1: i32) -> (i32, i32, i32) {
    %c0_i32 = arith.constant 0 : i32
    %c0_i32_0 = arith.constant 0 : i32
    return %arg0, %arg1, %c0_i32 : i32, i32, i32
  }
  func.func @transform_1(%arg0: i32, %arg1: i32) -> (i32, i32, i32, i32) {
    %c0_i32 = arith.constant 0 : i32
    %c0_i32_0 = arith.constant 0 : i32
    %c0_i32_1 = arith.constant 0 : i32
    return %arg0, %arg1, %c0_i32, %c0_i32_0 : i32, i32, i32, i32
  }
  func.func @transform_2(%arg0: i32, %arg1: i32) -> (i32, i32, i32) {
    %c1_i32 = arith.constant 1 : i32
    %0 = arith.muli %arg0, %c1_i32 : i32
    %1 = arith.addi %0, %arg1 : i32
    %c0_i32 = arith.constant 0 : i32
    %c0_i32_0 = arith.constant 0 : i32
    %c0_i32_1 = arith.constant 0 : i32
    return %1, %c0_i32, %c0_i32_0 : i32, i32, i32
  }
}

</mosaic_0001>

<bundles_post_ra>
// kernel: tpu_custom_call.1
= control target key start
LH: loop header
LB: loop body
LE: loop exit
PB: predicated region body
PF: predicated region fallthrough
CT: control target
= control target key end

     0   :  { %vm61_vm0 = vcmask 1044480   ;;  %vm150_vm1 = vcmask 1046528   ;;  %vm303_vm2 = vcmask 1045504   ;;  %vm432_vm3 = vcmask 1043456   ;;  %s3580_s0 = inlined_call_operand.vmem [shape: f32[8,16,16], index: 0, kind: input, shape index: {}]   ;;  %s3581_s1 = inlined_call_operand.vmem [shape: f32[8,1,10,16], index: 1, kind: input, shape index: {}]   ;;  %s3582_s2 = inlined_call_operand.hbm [shape: f32[1,1,2], index: 2, kind: output, shape index: {}]  }
   0x1   :  { %v17_v0 = vld [vmem:[%s3580_s0 + $0x20] sm:$0xff]  ;;  %v18_v1 = vld [vmem:[%s3580_s0 + $0x28] sm:$0xff]  ;;  %v15_v7 = vld [vmem:[%s3580_s0 + $0x10] sm:$0xff] }
   0x2   :  { %v33_v2 = vld [vmem:[%s3581_s1 + $0x20] sm:$0xff]  ;;  %v1932_v3 = vld [vmem:[%s3581_s1 + $0x28] sm:$0x3]  ;;  %v68_v4 = vrot.slane %v17_v0, 3  ;;  %v69_v5 = vrot.slane %v18_v1, 3  ;;  %v16_v8 = vld [vmem:[%s3580_s0 + $0x18] sm:$0xff] }
   0x3   :  { %v170_v6 = vrot.slane %v1932_v3, 1  ;;  %v31_v9 = vld [vmem:[%s3581_s1 + $0x10] sm:$0xff]  ;;  %v1952_v13 = vld [vmem:[%s3581_s1 + $0x18] sm:$0x3]  ;;  %v65_v14 = vrot.slane %v15_v7, 3  ;;  %v66_v20 = vrot.slane %v16_v8, 3 }
   0x4   :  { %v70_v10 = vsel %vm61_vm0, %v68_v4, %v69_v5  ;;  %v112_v11 = vsel %vm61_vm0, %v33_v2, %v68_v4  ;;  %v1947_v12 = vsel %vm61_vm0, %v69_v5, %v33_v2  ;;  %v13_v22 = vld [vmem:[%s3580_s0] sm:$0xff]  ;;  %v14_v23 = vld [vmem:[%s3580_s0 + $0x8] sm:$0xff]  ;;  %v163_v27 = vrot.slane %v1952_v13, 1 }
   0x5   :  { %v165_v15 = vrot.slane %v112_v11, 1  ;;  %v166_v16 = vrot.slane %v70_v10, 1  ;;  %v168_v17 = vrot.slane %v1947_v12, 1  ;;  %v531_v18 = vrot.slane %v70_v10, 2  ;;  %v29_v34 = vld [vmem:[%s3581_s1] sm:$0xff] }
   0x6   :  { %v532_v19 = vrot.slane %v1947_v12, 2  ;;  %v111_v21 = vsel %vm61_vm0, %v31_v9, %v65_v14  ;;  %v1973_v32 = vsel %vm61_vm0, %v65_v14, %v66_v20  ;;  %v1976_v33 = vsel %vm61_vm0, %v66_v20, %v31_v9 }
   0x7   :  { %v167_v24 = vsel %vm150_vm1, %v165_v15, %v166_v16  ;;  %v169_v25 = vsel %vm150_vm1, %v166_v16, %v168_v17  ;;  %v171_v26 = vsel %vm150_vm1, %v168_v17, %v170_v6  ;;  %v158_v31 = vrot.slane %v111_v21, 1 }
   0x8   :  { %v247_v28 = vadd.f32 %v167_v24, %v112_v11  ;;  %v248_v29 = vadd.f32 %v169_v25, %v70_v10  ;;  %v1970_v30 = vadd.f32 %v171_v26, %v1947_v12  ;;  %v62_v35 = vrot.slane %v13_v22, 3 }
   0x9   :  { %v63_v36 = vrot.slane %v14_v23, 3 }
   0xa   :  { %7 = vsyncpa [#allocation3], 0  ;;  %v318_v37 = vrot.slane %v247_v28, 2  ;;  %v319_v38 = vrot.slane %v248_v29, 2  ;;  %v321_v39 = vrot.slane %v1970_v30, 2  ;;  %v159_v40 = vrot.slane %v1973_v32, 1 }
   0xb   :  { %v533_v41 = vsel %vm303_vm2, %v531_v18, %v532_v19  ;;  %v161_v42 = vrot.slane %v1976_v33, 1  ;;  %v526_v43 = vrot.slane %v1973_v32, 2  ;;  %v64_v44 = vsel %vm61_vm0, %v62_v35, %v63_v36  ;;  %v2009_v57 = vld [vmem:[%s3581_s1 + $0x8] sm:$0x3]  ;;  %s1889_s5 = smov 123   ;;  %s1891_s19 = smov 127  }
   0xc   :  { %v320_v45 = vsel %vm303_vm2, %v318_v37, %v319_v38  ;;  %v322_v46 = vsel %vm303_vm2, %v319_v38, %v321_v39  ;;  %v160_v47 = vsel %vm150_vm1, %v158_v31, %v159_v40  ;;  %v110_v48 = vsel %vm61_vm0, %v29_v34, %v62_v35  ;;  %v2075_v12 = vld [vmem:[%s3581_s1 + $0x48] sm:$0x3]  ;;  %s1893_s20 = smov 3   ;;  %s1894_s21 = smov 5  }
   0xd   :  { %v390_v49 = vadd.f32 %v320_v45, %v247_v28  ;;  %v1995_v50 = vadd.f32 %v322_v46, %v248_v29  ;;  %v162_v51 = vsel %vm150_vm1, %v159_v40, %v161_v42  ;;  %v164_v52 = vsel %vm150_vm1, %v161_v42, %v163_v27  ;;  %s1895_s22 = smov 7   ;;  %s1896_s23 = smov 9  }
   0xe   :  { %v243_v53 = vadd.f32 %v160_v47, %v111_v21  ;;  %v244_v54 = vadd.f32 %v162_v51, %v1973_v32  ;;  %v2003_v55 = vadd.f32 %v164_v52, %v1976_v33  ;;  %v527_v56 = vrot.slane %v1976_v33, 2  ;;  %v22_v52 = vld [vmem:[%s3580_s0 + $0x48] sm:$0xff]  ;;  %v20_v33 = vld [vmem:[%s3580_s0 + $0x38] sm:$0xff]  ;;  %s1897_s24 = smov 11   ;;  %s1898_s25 = smov 13  }
   0xf   :  { %v443_v58 = vrot.slane %v390_v49, 4  ;;  %v444_v59 = vrot.slane %v1995_v50, 4  ;;  %v2013_v60 = vsel %vm61_vm0, %v63_v36, %v29_v34  ;;  %v151_v61 = vrot.slane %v110_v48, 1  ;;  %s1899_s26 = smov 15   ;;  %s1900_s27 = smov 126  }
  0x10   :  { %v311_v62 = vrot.slane %v243_v53, 2  ;;  %v312_v63 = vrot.slane %v244_v54, 2  ;;  %v314_v0 = vrot.slane %v2003_v55, 2  ;;  %v152_v1 = vrot.slane %v64_v44, 1  ;;  %s1901_s28 = smov 124   ;;  %s1902_s29 = smov 120  }
  0x11   :  { %v445_v2 = vsel %vm432_vm3, %v443_v58, %v444_v59  ;;  %v154_v4 = vrot.slane %v2013_v60, 1  ;;  %v156_v5 = vrot.slane %v2009_v57, 1  ;;  %v521_v7 = vrot.slane %v64_v44, 2  ;;  %s1903_s30 = smov 118   ;;  %s1818_s11 = sshll.u32 %s3582_s2, 4  ;;  %s1819_s11 = int_to_ptr.hbm [resolvable:$true] %s1818_s11 }
  0x12   :  { %v493_v8 = vadd.f32 %v445_v2, %v390_v49  ;;  %v313_v9 = vsel %vm303_vm2, %v311_v62, %v312_v63  ;;  %v315_v10 = vsel %vm303_vm2, %v312_v63, %v314_v0  ;;  %v153_v11 = vsel %vm150_vm1, %v151_v61, %v152_v1  ;;  %v37_v2 = vld [vmem:[%s3581_s1 + $0x40] sm:$0xff] }
  0x13   :  { %v387_v14 = vadd.f32 %v313_v9, %v243_v53  ;;  %v2024_v15 = vadd.f32 %v315_v10, %v244_v54  ;;  %v155_v16 = vsel %vm150_vm1, %v152_v1, %v154_v4  ;;  %v157_v17 = vsel %vm150_vm1, %v154_v4, %v156_v5 }
  0x14   :  { %v509_v18 = vadd.f32 %v493_v8, %v248_v29  ;;  %v239_v20 = vadd.f32 %v153_v11, %v110_v48  ;;  %v240_v21 = vadd.f32 %v155_v16, %v64_v44  ;;  %v2029_v22 = vadd.f32 %v157_v17, %v2013_v60 }
  0x15   :  { %v438_v23 = vrot.slane %v387_v14, 4  ;;  %v439_v24 = vrot.slane %v2024_v15, 4  ;;  %v522_v25 = vrot.slane %v2013_v60, 2  ;;  %v250_v26 = vadd.f32 %v170_v6, %v1932_v3 }
  0x16   :  { %v2036_v28 = vadd.f32 %v533_v41, %v509_v18  ;;  %v304_v31 = vrot.slane %v239_v20, 2  ;;  %v305_v32 = vrot.slane %v240_v21, 2  ;;  %v307_v29 = vrot.slane %v2029_v22, 2 }
  0x17   :  { %v440_v34 = vsel %vm432_vm3, %v438_v23, %v439_v24  ;;  %v323_v35 = vrot.slane %v250_v26, 2  ;;  %v534_v36 = vrot.slane %v1932_v3, 2  ;;  %v246_v40 = vadd.f32 %v163_v27, %v1952_v13 }
  0x18   :  { %617 = vrot.lane.b32.xlu2 %v2036_v28, %s1889_s5  ;;  %v491_v37 = vadd.f32 %v440_v34, %v387_v14  ;;  %v306_v38 = vsel %vm303_vm2, %v304_v31, %v305_v32  ;;  %v308_v6 = vsel %vm303_vm2, %v305_v32, %v307_v29  ;;  %v528_v41 = vsel %vm303_vm2, %v526_v43, %v527_v56 }
  0x19   :  { %v384_v42 = vadd.f32 %v306_v38, %v239_v20  ;;  %v385_v44 = vadd.f32 %v308_v6, %v240_v21  ;;  %v324_v3 = vsel %vm303_vm2, %v321_v39, %v323_v35  ;;  %v523_v46 = vsel %vm303_vm2, %v521_v7, %v522_v25  ;;  %v21_v39 = vld [vmem:[%s3580_s0 + $0x40] sm:$0xff]  ;;  %v19_v20 = vld [vmem:[%s3580_s0 + $0x30] sm:$0xff] }
  0x1a   :  { %v507_v45 = vadd.f32 %v491_v37, %v244_v54  ;;  %v392_v47 = vadd.f32 %v324_v3, %v1970_v30  ;;  %v316_v48 = vrot.slane %v246_v40, 2  ;;  %v535_v43 = vsel %vm303_vm2, %v532_v19, %v534_v36  ;;  %v35_v38 = vld [vmem:[%s3581_s1 + $0x30] sm:$0xff] }
  0x1b   :  { %v433_v49 = vrot.slane %v384_v42, 4  ;;  %v434_v27 = vrot.slane %v385_v44, 4  ;;  %v242_v51 = vadd.f32 %v156_v5, %v2009_v57  ;;  %v529_v61 = vrot.slane %v1952_v13, 2 }
  0x1c   :  { %v2068_v53 = vadd.f32 %v528_v41, %v507_v45  ;;  %v446_v54 = vrot.slane %v392_v47, 4  ;;  %v317_v58 = vsel %vm303_vm2, %v314_v0, %v316_v48  ;;  %v524_v1 = vrot.slane %v2009_v57, 2 }
  0x1d   :  { %v435_v19 = vsel %vm432_vm3, %v433_v49, %v434_v27  ;;  %v389_v62 = vadd.f32 %v317_v58, %v2003_v55  ;;  %v309_v63 = vrot.slane %v242_v51, 2  ;;  %v74_v4 = vrot.slane %v21_v39, 3 }
  0x1e   :  { %613 = vrot.lane.b32.xlu1 %v2068_v53, %s1889_s5  ;;  %v489_v13 = vadd.f32 %v435_v19, %v384_v42  ;;  %v447_v0 = vsel %vm432_vm3, %v444_v59, %v446_v54  ;;  %v75_v5 = vrot.slane %v22_v52, 3  ;;  %v184_v57 = vrot.slane %v2075_v12, 1 }
  0x1f   :  { %v494_v7 = vadd.f32 %v447_v0, %v1995_v50  ;;  %v441_v8 = vrot.slane %v389_v62, 4  ;;  %v310_v9 = vsel %vm303_vm2, %v307_v29, %v309_v63  ;;  %v114_v16 = vsel %vm61_vm0, %v37_v2, %v74_v4 }
  0x20   :  { %v505_v10 = vadd.f32 %v489_v13, %v240_v21  ;;  %v386_v11 = vadd.f32 %v310_v9, %v2029_v22  ;;  %v2093_v14 = vsel %vm61_vm0, %v74_v4, %v75_v5  ;;  %v2099_v18 = vsel %vm61_vm0, %v75_v5, %v37_v2  ;;  %v23_v2 = vld [vmem:[%s3580_s0 + $0x50] sm:$0xff] }
  0x21   :  { %v510_v17 = vadd.f32 %v494_v7, %v1970_v30  ;;  %v442_v59 = vsel %vm432_vm3, %v439_v24, %v441_v8  ;;  %v179_v50 = vrot.slane %v114_v16, 1  ;;  %v180_v31 = vrot.slane %v2093_v14, 1 }
  0x22   :  { %v2104_v21 = vadd.f32 %v523_v46, %v505_v10  ;;  %v492_v23 = vadd.f32 %v442_v59, %v2024_v15  ;;  %v436_v26 = vrot.slane %v386_v11, 4  ;;  %v530_v30 = vsel %vm303_vm2, %v527_v56, %v529_v61  ;;  %v36_v56 = vld [vmem:[%s3581_s1 + $0x38] sm:$0x3] }
  0x23   :  { %v2108_v32 = vadd.f32 %v535_v43, %v510_v17  ;;  %v525_v24 = vsel %vm303_vm2, %v522_v25, %v524_v1  ;;  %v182_v29 = vrot.slane %v2099_v18, 1  ;;  %v181_v35 = vsel %vm150_vm1, %v179_v50, %v180_v31  ;;  %v24_v11 = vld [vmem:[%s3580_s0 + $0x58] sm:$0xff]  ;;  %v39_v50 = vld [vmem:[%s3581_s1 + $0x50] sm:$0xff] }
  0x24   :  { %609 = vrot.lane.b32.xlu0 %v2104_v21, %s1889_s5  ;;  %v508_v15 = vadd.f32 %v492_v23, %v2003_v55  ;;  %v437_v34 = vsel %vm432_vm3, %v434_v27, %v436_v26  ;;  %v71_v60 = vrot.slane %v19_v20, 3  ;;  %v255_v37 = vadd.f32 %v181_v35, %v114_v16 }
  0x25   :  { %619 = vrot.lane.b32.xlu2 %v2108_v32, %s1889_s5  ;;  %v490_v25 = vadd.f32 %v437_v34, %v385_v44  ;;  %v183_v36 = vsel %vm150_vm1, %v180_v31, %v182_v29  ;;  %v185_v55 = vsel %vm150_vm1, %v182_v29, %v184_v57  ;;  %v541_v42 = vrot.slane %v2093_v14, 2 }
  0x26   :  { %v2137_v6 = vadd.f32 %v530_v30, %v508_v15  ;;  %v256_v40 = vadd.f32 %v183_v36, %v2093_v14  ;;  %v2141_v41 = vadd.f32 %v185_v55, %v2099_v18  ;;  %v332_v3 = vrot.slane %v255_v37, 2  ;;  %v40_v14 = vld [vmem:[%s3581_s1 + $0x58] sm:$0x3] }
  0x27   :  { %v506_v44 = vadd.f32 %v490_v25, %v2029_v22  ;;  %v72_v45 = vrot.slane %v20_v33, 3  ;;  %v177_v46 = vrot.slane %v36_v56, 1  ;;  %v542_v49 = vrot.slane %v2099_v18, 2  ;;  %v26_v18 = vld [vmem:[%s3580_s0 + $0x68] sm:$0xff] }
  0x28   :  { %615 = vrot.lane.b32.xlu1 %v2137_v6, %s1889_s5  ;;  %v333_v47 = vrot.slane %v256_v40, 2  ;;  %v335_v48 = vrot.slane %v2141_v41, 2  ;;  %v113_v27 = vsel %vm61_vm0, %v35_v38, %v71_v60  ;;  %v539_v1 = vrot.slane %v36_v56, 2 }
  0x29   :  { %v2150_v43 = vadd.f32 %v525_v24, %v506_v44  ;;  %v73_v51 = vsel %vm61_vm0, %v71_v60, %v72_v45  ;;  %v121_v39 = vsel %vm61_vm0, %v72_v45, %v35_v38  ;;  %v254_v22 = vadd.f32 %v177_v46, %v36_v56 }
  0x2a   :  { %v334_v52 = vsel %vm303_vm2, %v332_v3, %v333_v47  ;;  %v336_v54 = vsel %vm303_vm2, %v333_v47, %v335_v48  ;;  %v173_v58 = vrot.slane %v73_v51, 1  ;;  %v175_v61 = vrot.slane %v121_v39, 1 }
  0x2b   :  { %v396_v19 = vadd.f32 %v334_v52, %v255_v37  ;;  %v2158_v62 = vadd.f32 %v336_v54, %v256_v40  ;;  %v330_v63 = vrot.slane %v254_v22, 2  ;;  %v537_v4 = vrot.slane %v121_v39, 2 }
  0x2c   :  { %611 = vrot.lane.b32.xlu0 %v2150_v43, %s1889_s5  ;;  %v176_v13 = vsel %vm150_vm1, %v173_v58, %v175_v61  ;;  %v178_v0 = vsel %vm150_vm1, %v175_v61, %v177_v46  ;;  %v172_v5 = vrot.slane %v113_v27, 1  ;;  %v543_v16 = vsel %vm303_vm2, %v541_v42, %v542_v49 }
  0x2d   :  { %v453_v7 = vrot.slane %v396_v19, 4  ;;  %v454_v8 = vrot.slane %v2158_v62, 4  ;;  %v252_v9 = vadd.f32 %v176_v13, %v73_v51  ;;  %v253_v10 = vadd.f32 %v178_v0, %v121_v39 }
  0x2e   :  { %v174_v17 = vsel %vm150_vm1, %v172_v5, %v173_v58  ;;  %v536_v59 = vrot.slane %v73_v51, 2  ;;  %v77_v20 = vrot.slane %v23_v2, 3  ;;  %v540_v29 = vsel %vm303_vm2, %v537_v4, %v539_v1 }
  0x2f   :  { %v455_v23 = vsel %vm432_vm3, %v453_v7, %v454_v8  ;;  %v326_v26 = vrot.slane %v252_v9, 2  ;;  %v328_v31 = vrot.slane %v253_v10, 2  ;;  %v251_v30 = vadd.f32 %v174_v17, %v113_v27  ;;  %v27_v7 = vld [vmem:[%s3580_s0 + $0x70] sm:$0xff] }
  0x30   :  { %v497_v24 = vadd.f32 %v455_v23, %v396_v19  ;;  %v78_v15 = vrot.slane %v24_v11, 3  ;;  %v191_v34 = vrot.slane %v40_v14, 1  ;;  %v115_v60 = vsel %vm61_vm0, %v39_v50, %v77_v20 }
  0x31   :  { %v329_v35 = vsel %vm303_vm2, %v326_v26, %v328_v31  ;;  %v331_v33 = vsel %vm303_vm2, %v328_v31, %v330_v63  ;;  %v325_v56 = vrot.slane %v251_v30, 2  ;;  %v549_v39 = vrot.slane %v40_v14, 2 }
  0x32   :  { %v513_v25 = vadd.f32 %v497_v24, %v256_v40  ;;  %v394_v36 = vadd.f32 %v329_v35, %v252_v9  ;;  %v395_v55 = vadd.f32 %v331_v33, %v253_v10  ;;  %v2189_v37 = vsel %vm61_vm0, %v77_v20, %v78_v15  ;;  %v2235_v35 = vld [vmem:[%s3581_s1 + $0x78] sm:$0x3] }
  0x33   :  { %v327_v38 = vsel %vm303_vm2, %v325_v56, %v326_v26  ;;  %v2193_v42 = vsel %vm61_vm0, %v78_v15, %v39_v50  ;;  %v187_v44 = vrot.slane %v2189_v37, 1  ;;  %v262_v3 = vadd.f32 %v191_v34, %v40_v14 }
  0x34   :  { %v2196_v45 = vadd.f32 %v543_v16, %v513_v25  ;;  %v449_v46 = vrot.slane %v394_v36, 4  ;;  %v451_v47 = vrot.slane %v395_v55, 4  ;;  %v393_v27 = vadd.f32 %v327_v38, %v251_v30  ;;  %v28_v30 = vld [vmem:[%s3580_s0 + $0x78] sm:$0xff] }
  0x35   :  { %v538_v40 = vsel %vm303_vm2, %v536_v59, %v537_v4  ;;  %v189_v51 = vrot.slane %v2193_v42, 1  ;;  %v186_v22 = vrot.slane %v115_v60, 1  ;;  %v547_v58 = vrot.slane %v2193_v42, 2 }
  0x36   :  { %625 = vrot.lane.b32.xlu2 %v2196_v45, %s1889_s5  ;;  %v452_v52 = vsel %vm432_vm3, %v449_v46, %v451_v47  ;;  %v448_v54 = vrot.slane %v393_v27, 4  ;;  %v258_v61 = vadd.f32 %v184_v57, %v2075_v12  ;;  %v344_v2 = vrot.slane %v262_v3, 2 }
  0x37   :  { %v496_v19 = vadd.f32 %v452_v52, %v394_v36  ;;  %v190_v63 = vsel %vm150_vm1, %v187_v44, %v189_v51  ;;  %v192_v1 = vsel %vm150_vm1, %v189_v51, %v191_v34  ;;  %v188_v5 = vsel %vm150_vm1, %v186_v22, %v187_v44 }
  0x38   :  { %v450_v13 = vsel %vm432_vm3, %v448_v54, %v449_v46  ;;  %v260_v0 = vadd.f32 %v190_v63, %v2189_v37  ;;  %v261_v4 = vadd.f32 %v192_v1, %v2193_v42  ;;  %v259_v14 = vadd.f32 %v188_v5, %v115_v60 }
  0x39   :  { %v512_v11 = vadd.f32 %v496_v19, %v253_v10  ;;  %v495_v57 = vadd.f32 %v450_v13, %v393_v27  ;;  %v546_v16 = vrot.slane %v2189_v37, 2  ;;  %v550_v50 = vsel %vm303_vm2, %v547_v58, %v549_v39  ;;  %v43_v10 = vld [vmem:[%s3581_s1 + $0x70] sm:$0xff]  ;;  %v25_v13 = vld [vmem:[%s3580_s0 + $0x60] sm:$0xff] }
  0x3a   :  { %v340_v17 = vrot.slane %v260_v0, 2  ;;  %v342_v59 = vrot.slane %v261_v4, 2  ;;  %v337_v20 = vrot.slane %v258_v61, 2  ;;  %v339_v31 = vrot.slane %v259_v14, 2 }
  0x3b   :  { %v2218_v23 = vadd.f32 %v540_v29, %v512_v11  ;;  %v511_v26 = vadd.f32 %v495_v57, %v252_v9  ;;  %v83_v24 = vrot.slane %v27_v7, 3  ;;  %v544_v9 = vrot.slane %v2075_v12, 2 }
  0x3c   :  { %v343_v15 = vsel %vm303_vm2, %v340_v17, %v342_v59  ;;  %v345_v34 = vsel %vm303_vm2, %v342_v59, %v344_v2  ;;  %v338_v29 = vsel %vm303_vm2, %v335_v48, %v337_v20  ;;  %v341_v25 = vsel %vm303_vm2, %v339_v31, %v340_v17 }
  0x3d   :  { %623 = vrot.lane.b32.xlu1 %v2218_v23, %s1889_s5  ;;  %v2239_v33 = vadd.f32 %v538_v40, %v511_v26  ;;  %v400_v56 = vadd.f32 %v343_v15, %v260_v0  ;;  %v401_v60 = vadd.f32 %v345_v34, %v261_v4  ;;  %v399_v36 = vadd.f32 %v341_v25, %v259_v14  ;;  %v41_v14 = vld [vmem:[%s3581_s1 + $0x60] sm:$0xff] }
  0x3e   :  { %v398_v55 = vadd.f32 %v338_v29, %v2141_v41  ;;  %v84_v48 = vrot.slane %v28_v30, 3  ;;  %v117_v12 = vsel %vm61_vm0, %v43_v10, %v83_v24  ;;  %v205_v44 = vrot.slane %v2235_v35, 1 }
  0x3f   :  { %621 = vrot.lane.b32.xlu0 %v2239_v33, %s1889_s5  ;;  %v459_v37 = vrot.slane %v400_v56, 4  ;;  %v461_v38 = vrot.slane %v401_v60, 4  ;;  %v200_v42 = vrot.slane %v117_v12, 1  ;;  %v458_v3 = vrot.slane %v399_v36, 4 }
  0x40   :  { %v456_v46 = vrot.slane %v398_v55, 4  ;;  %v2248_v47 = vsel %vm61_vm0, %v83_v24, %v84_v48  ;;  %v2251_v27 = vsel %vm61_vm0, %v84_v48, %v43_v10  ;;  %v548_v51 = vsel %vm303_vm2, %v546_v16, %v547_v58 }
  0x41   :  { %v462_v40 = vsel %vm432_vm3, %v459_v37, %v461_v38  ;;  %v201_v39 = vrot.slane %v2248_v47, 1  ;;  %v203_v22 = vrot.slane %v2251_v27, 1  ;;  %v460_v54 = vsel %vm432_vm3, %v458_v3, %v459_v37 }
  0x42   :  { %v500_v52 = vadd.f32 %v462_v40, %v400_v56  ;;  %v457_v61 = vsel %vm432_vm3, %v454_v8, %v456_v46  ;;  %v545_v19 = vsel %vm303_vm2, %v542_v49, %v544_v9  ;;  %v499_v63 = vadd.f32 %v460_v54, %v399_v36 }
  0x43   :  { %v498_v1 = vadd.f32 %v457_v61, %v2158_v62  ;;  %v202_v58 = vsel %vm150_vm1, %v200_v42, %v201_v39  ;;  %v204_v2 = vsel %vm150_vm1, %v201_v39, %v203_v22  ;;  %v206_v7 = vsel %vm150_vm1, %v203_v22, %v205_v44 }
  0x44   :  { %v516_v5 = vadd.f32 %v500_v52, %v261_v4  ;;  %v267_v11 = vadd.f32 %v202_v58, %v117_v12  ;;  %v268_v8 = vadd.f32 %v204_v2, %v2248_v47  ;;  %v515_v49 = vadd.f32 %v499_v63, %v260_v0  ;;  %v2285_v4 = vld [vmem:[%s3581_s1 + $0x68] sm:$0x3]  ;;  %s1890_s1 = smov 125  }
  0x45   :  { %v514_v62 = vadd.f32 %v498_v1, %v2141_v41  ;;  %v2277_v57 = vadd.f32 %v206_v7, %v2251_v27  ;;  %v80_v20 = vrot.slane %v25_v13, 3  ;;  %v81_v31 = vrot.slane %v26_v18, 3 }
  0x46   :  { %v2287_v16 = vadd.f32 %v550_v50, %v516_v5  ;;  %v353_v17 = vrot.slane %v267_v11, 2  ;;  %v354_v59 = vrot.slane %v268_v8, 2  ;;  %v2289_v0 = vadd.f32 %v548_v51, %v515_v49 }
  0x47   :  { %v2291_v41 = vadd.f32 %v545_v19, %v514_v62  ;;  %v356_v26 = vrot.slane %v2277_v57, 2  ;;  %v198_v10 = vrot.slane %v2285_v4, 1  ;;  %v116_v50 = vsel %vm61_vm0, %v41_v14, %v80_v20 }
  0x48   :  { %3585 = vst [vmem:[#allocation5_spill] sm:$0xff] %v2287_v16  ;;  %631 = vrot.lane.b32.xlu2 %v2287_v16, %s1889_s5  ;;  %v355_v30 = vsel %vm303_vm2, %v353_v17, %v354_v59  ;;  %629 = vrot.lane.b32.xlu1 %v2289_v0, %s1889_s5  ;;  %v82_v34 = vsel %vm61_vm0, %v80_v20, %v81_v31  ;;  %v193_v29 = vrot.slane %v116_v50, 1  ;;  %v556_v55 = vrot.slane %v2248_v47, 2 }
  0x49   :  { %627 = vrot.lane.b32.xlu0 %v2291_v41, %s1889_s5  ;;  %v357_v24 = vsel %vm303_vm2, %v354_v59, %v356_v26  ;;  %v405_v15 = vadd.f32 %v355_v30, %v267_v11  ;;  %v124_v56 = vsel %vm61_vm0, %v81_v31, %v41_v14  ;;  %v194_v60 = vrot.slane %v82_v34, 1 }
  0x4a   :  { %v406_v9 = vadd.f32 %v357_v24, %v268_v8  ;;  %v266_v25 = vadd.f32 %v198_v10, %v2285_v4  ;;  %v196_v48 = vrot.slane %v124_v56, 1  ;;  %v557_v37 = vrot.slane %v2251_v27, 2 }
  0x4b   :  { %v468_v36 = vrot.slane %v405_v15, 4  ;;  %v195_v38 = vsel %vm150_vm1, %v193_v29, %v194_v60  ;;  %v270_v42 = vadd.f32 %v205_v44, %v2235_v35  ;;  %v552_v62 = vrot.slane %v124_v56, 2 }
  0x4c   :  { %v469_v12 = vrot.slane %v406_v9, 4  ;;  %v197_v3 = vsel %vm150_vm1, %v194_v60, %v196_v48  ;;  %v199_v46 = vsel %vm150_vm1, %v196_v48, %v198_v10  ;;  %v263_v40 = vadd.f32 %v195_v38, %v116_v50 }
  0x4d   :  { %v264_v39 = vadd.f32 %v197_v3, %v82_v34  ;;  %v265_v22 = vadd.f32 %v199_v46, %v124_v56  ;;  %v351_v52 = vrot.slane %v266_v25, 2  ;;  %v358_v61 = vrot.slane %v270_v42, 2 }
  0x4e   :  { %v470_v51 = vsel %vm432_vm3, %v468_v36, %v469_v12  ;;  %v346_v47 = vrot.slane %v263_v40, 2  ;;  %v558_v19 = vsel %vm303_vm2, %v556_v55, %v557_v37  ;;  %v554_v14 = vrot.slane %v2285_v4, 2 }
  0x4f   :  { %v503_v54 = vadd.f32 %v470_v51, %v405_v15  ;;  %v347_v27 = vrot.slane %v264_v39, 2  ;;  %v349_v63 = vrot.slane %v265_v22, 2  ;;  %v359_v44 = vsel %vm303_vm2, %v356_v26, %v358_v61 }
  0x50   :  { %v407_v5 = vadd.f32 %v359_v44, %v2277_v57  ;;  %v551_v26 = vrot.slane %v82_v34, 2  ;;  %v555_v15 = vsel %vm303_vm2, %v552_v62, %v554_v14  ;;  %v559_v25 = vrot.slane %v2235_v35, 2 }
  0x51   :  { %v519_v1 = vadd.f32 %v503_v54, %v268_v8  ;;  %v350_v58 = vsel %vm303_vm2, %v347_v27, %v349_v63  ;;  %v352_v2 = vsel %vm303_vm2, %v349_v63, %v351_v52  ;;  %v348_v13 = vsel %vm303_vm2, %v346_v47, %v347_v27 }
  0x52   :  { %v403_v11 = vadd.f32 %v350_v58, %v264_v39  ;;  %v404_v18 = vadd.f32 %v352_v2, %v265_v22  ;;  %v402_v49 = vadd.f32 %v348_v13, %v263_v40  ;;  %v471_v17 = vrot.slane %v407_v5, 4 }
  0x53   :  { %v2320_v7 = vadd.f32 %v558_v19, %v519_v1  ;;  %v553_v4 = vsel %vm303_vm2, %v551_v26, %v552_v62  ;;  %v560_v48 = vsel %vm303_vm2, %v557_v37, %v559_v25  ;;  %vm1154_vm4 = vcmask 15360  }
  0x54   :  { %v464_v8 = vrot.slane %v403_v11, 4  ;;  %v466_v59 = vrot.slane %v404_v18, 4  ;;  %v463_v20 = vrot.slane %v402_v49, 4  ;;  %v472_v10 = vsel %vm432_vm3, %v469_v12, %v471_v17 }
  0x55   :  { %3586 = vst [vmem:[#allocation6_spill] sm:$0xff] %v2320_v7  ;;  %637 = vrot.lane.b32.xlu2 %v2320_v7, %s1889_s5  ;;  %v504_v60 = vadd.f32 %v472_v10, %v406_v9  ;;  %vm1137_vm5 = vcmask 7168   ;;  %vm1171_vm6 = vcmask 23552   ;;  %vm1205_vm7 = vcmask 39936  }
  0x56   :  { %v467_v31 = vsel %vm432_vm3, %v464_v8, %v466_v59  ;;  %v465_v30 = vsel %vm432_vm3, %v463_v20, %v464_v8  ;;  %vm1188_vm8 = vcmask 31744   ;;  %vm1222_vm9 = vcmask 171008  }
  0x57   :  { %v502_v50 = vadd.f32 %v467_v31, %v403_v11  ;;  %v501_v24 = vadd.f32 %v465_v30, %v402_v49  ;;  %v520_v55 = vadd.f32 %v504_v60, %v2277_v57  ;;  %vm1256_vm10 = vcmask 187392  }
  0x58   :  { %vm1239_vm11 = vcmask 179200   ;;  %vm1273_vm12 = vcmask 195584   ;;  %vm1290_vm13 = vcmask 203776   ;;  %vm1707_vm14 = vcmask 130048  }
  0x59   :  { %v518_v29 = vadd.f32 %v502_v50, %v265_v22  ;;  %v517_v56 = vadd.f32 %v501_v24, %v264_v39  ;;  %v2342_v9 = vadd.f32 %v560_v48, %v520_v55  ;;  %vm1807_vm15 = vcmask 8192  }
  0x5b   :  { %v2331_v36 = vadd.f32 %v555_v15, %v518_v29  ;;  %v2333_v34 = vadd.f32 %v553_v4, %v517_v56 }
  0x5d   :  { %659 = vrot.lane.b32.xlu2 %v2150_v43, %s1890_s1  ;;  %635 = vrot.lane.b32.xlu1 %v2331_v36, %s1889_s5 }
  0x5e   :  { %633 = vrot.lane.b32.xlu0 %v2333_v34, %s1889_s5 }
  0x65   :  { %665 = vrot.lane.b32.xlu2 %v2036_v28, %s1890_s1  ;;  %657 = vrot.lane.b32.xlu1 %v2104_v21, %s1890_s1 }
  0x66   :  { %639 = vrot.lane.b32.xlu0 %v2342_v9, %s1889_s5  ;;  %s1892_s5 = smov 1  }
  0x6d   :  { %671 = vrot.lane.b32.xlu2 %v2218_v23, %s1890_s1  ;;  %663 = vrot.lane.b32.xlu1 %v2137_v6, %s1890_s1 }
  0x6e   :  { %661 = vrot.lane.b32.xlu0 %v2068_v53, %s1890_s1 }
  0x72   :  { %v2361_v35 = vpop.permute.xlu2 %617 }
  0x73   :  { %3587 = vst [vmem:[#allocation7_spill] sm:$0xff] %v2361_v35 }
  0x75   :  { %677 = vrot.lane.b32.xlu2 %v2289_v0, %s1890_s1  ;;  %669 = vrot.lane.b32.xlu1 %v2239_v33, %s1890_s1 }
  0x76   :  { %667 = vrot.lane.b32.xlu0 %v2108_v32, %s1890_s1 }
  0x7d   :  { %683 = vrot.lane.b32.xlu2 %v2331_v36, %s1890_s1  ;;  %675 = vrot.lane.b32.xlu1 %v2291_v41, %s1890_s1 }
  0x7e   :  { %673 = vrot.lane.b32.xlu0 %v2196_v45, %s1890_s1 }
  0x7f   :  { %v2367_v57 = vpop.permute.xlu2 %619 }
  0x80   :  { %3588 = vst [vmem:[#allocation8_spill] sm:$0xff] %v2367_v57 }
  0x85   :  { %705 = vrot.lane.b32.xlu2 %v2104_v21, %s1891_s19  ;;  %681 = vrot.lane.b32.xlu1 %v2333_v34, %s1890_s1 }
  0x86   :  { %679 = vrot.lane.b32.xlu0 %v2287_v16, %s1890_s1 }
  0x8d   :  { %711 = vrot.lane.b32.xlu2 %v2137_v6, %s1891_s19  ;;  %687 = vrot.lane.b32.xlu1 %v2342_v9, %s1890_s1 }
  0x8e   :  { %685 = vrot.lane.b32.xlu0 %v2320_v7, %s1890_s1 }
  0x90   :  { %v2375_v12 = vpop.permute.xlu2 %625  ;;  %v2391_v38 = vpop.permute.xlu1 %613 }
  0x91   :  { %3589 = vst [vmem:[#allocation9_spill] sm:$0xff] %v2375_v12 }
  0x95   :  { %717 = vrot.lane.b32.xlu2 %v2239_v33, %s1891_s19  ;;  %709 = vrot.lane.b32.xlu1 %v2068_v53, %s1891_s19 }
  0x96   :  { %707 = vrot.lane.b32.xlu0 %v2150_v43, %s1891_s19  ;;  %v2393_v42 = vpop.permute.xlu0 %609 }
  0x9a   :  { %v2403_v46 = vpop.permute.xlu1 %615 }
  0x9d   :  { %723 = vrot.lane.b32.xlu2 %v2291_v41, %s1891_s19  ;;  %715 = vrot.lane.b32.xlu1 %v2108_v32, %s1891_s19 }
  0x9e   :  { %713 = vrot.lane.b32.xlu0 %v2036_v28, %s1891_s19  ;;  %v2405_v40 = vpop.permute.xlu0 %611 }
  0x9f   :  { %3592 = vst [vmem:[#allocation12_spill] sm:$0xff] %v2405_v40 }
  0xa2   :  { %v2385_v37 = vpop.permute.xlu2 %631 }
  0xa3   :  { %3590 = vst [vmem:[#allocation10_spill] sm:$0xff] %v2385_v37 }
  0xa5   :  { %729 = vrot.lane.b32.xlu2 %v2333_v34, %s1891_s19  ;;  %721 = vrot.lane.b32.xlu1 %v2196_v45, %s1891_s19 }
  0xa6   :  { %719 = vrot.lane.b32.xlu0 %v2218_v23, %s1891_s19 }
  0xad   :  { %735 = vrot.lane.b32.xlu2 %v2342_v9, %s1891_s19  ;;  %727 = vrot.lane.b32.xlu1 %v2287_v16, %s1891_s19 }
  0xae   :  { %725 = vrot.lane.b32.xlu0 %v2289_v0, %s1891_s19 }
  0xaf   :  { %v2401_v3 = vpop.permute.xlu2 %637  ;;  %v2415_v39 = vpop.permute.xlu1 %623 }
  0xb0   :  { %3591 = vst [vmem:[#allocation11_spill] sm:$0xff] %v2401_v3 }
  0xb1   :  { %3594 = vst [vmem:[#allocation14_spill] sm:$0xff] %v2415_v39  ;;  %v2417_v22 = vpop.permute.xlu0 %621 }
  0xb5   :  { %757 = vrot.lane.b32.xlu2 %v2068_v53, %s1892_s5  ;;  %733 = vrot.lane.b32.xlu1 %v2320_v7, %s1891_s19 }
  0xb6   :  { %731 = vrot.lane.b32.xlu0 %v2331_v36, %s1891_s19 }
  0xb7   :  { %v2413_v51 = vpop.permute.xlu2 %659 }
  0xb8   :  { %3593 = vst [vmem:[#allocation13_spill] sm:$0xff] %v2413_v51 }
  0xba   :  { %v2433_v54 = vpop.permute.xlu1 %629 }
  0xbb   :  { %3596 = vst [vmem:[#allocation16_spill] sm:$0xff] %v2433_v54  ;;  %v2435_v47 = vpop.permute.xlu0 %627 }
  0xbd   :  { %763 = vrot.lane.b32.xlu2 %v2108_v32, %s1892_s5  ;;  %755 = vrot.lane.b32.xlu1 %v2150_v43, %s1892_s5 }
  0xbe   :  { %753 = vrot.lane.b32.xlu0 %v2104_v21, %s1892_s5 }
  0xbf   :  { %v2425_v52 = vpop.permute.xlu2 %665 }
  0xc0   :  { %3595 = vst [vmem:[#allocation15_spill] sm:$0xff] %v2425_v52 }
  0xc5   :  { %769 = vrot.lane.b32.xlu2 %v2196_v45, %s1892_s5  ;;  %761 = vrot.lane.b32.xlu1 %v2036_v28, %s1892_s5 }
  0xc6   :  { %759 = vrot.lane.b32.xlu0 %v2137_v6, %s1892_s5 }
  0xc7   :  { %v2437_v61 = vpop.permute.xlu2 %671 }
  0xc8   :  { %3597 = vst [vmem:[#allocation17_spill] sm:$0xff] %v2437_v61 }
  0xcd   :  { %775 = vrot.lane.b32.xlu2 %v2287_v16, %s1892_s5  ;;  %767 = vrot.lane.b32.xlu1 %v2218_v23, %s1892_s5 }
  0xce   :  { %765 = vrot.lane.b32.xlu0 %v2239_v33, %s1892_s5 }
  0xcf   :  { %v2445_v19 = vpop.permute.xlu2 %677  ;;  %v2447_v27 = vpop.permute.xlu1 %635 }
  0xd0   :  { %3598 = vst [vmem:[#allocation18_spill] sm:$0xff] %v2445_v19  ;;  %v2449_v63 = vpop.permute.xlu0 %633 }
  0xd1   :  { %3599 = vst [vmem:[#allocation19_spill] sm:$0xff] %v2447_v27 }
  0xd5   :  { %781 = vrot.lane.b32.xlu2 %v2320_v7, %s1892_s5  ;;  %773 = vrot.lane.b32.xlu1 %v2289_v0, %s1892_s5 }
  0xd6   :  { %771 = vrot.lane.b32.xlu0 %v2291_v41, %s1892_s5 }
  0xd7   :  { %v2457_v1 = vpop.permute.xlu2 %683  ;;  %v2459_v44 = vpop.permute.xlu1 %657 }
  0xd8   :  { %3600 = vst [vmem:[#allocation20_spill] sm:$0xff] %v2457_v1  ;;  %v2461_v58 = vpop.permute.xlu0 %639 }
  0xdd   :  { %803 = vrot.lane.b32.xlu2 %v2150_v43, %s1893_s20  ;;  %779 = vrot.lane.b32.xlu1 %v2331_v36, %s1892_s5 }
  0xde   :  { %777 = vrot.lane.b32.xlu0 %v2333_v34, %s1892_s5 }
  0xdf   :  { %v2469_v2 = vpop.permute.xlu2 %705  ;;  %v2471_v13 = vpop.permute.xlu1 %663 }
  0xe0   :  { %v2473_v5 = vpop.permute.xlu0 %661 }
  0xe5   :  { %809 = vrot.lane.b32.xlu2 %v2036_v28, %s1893_s20  ;;  %801 = vrot.lane.b32.xlu1 %v2104_v21, %s1893_s20 }
  0xe6   :  { %783 = vrot.lane.b32.xlu0 %v2342_v9, %s1892_s5 }
  0xe7   :  { %v2481_v11 = vpop.permute.xlu2 %711  ;;  %v2483_v18 = vpop.permute.xlu1 %669 }
  0xe8   :  { %v2485_v49 = vpop.permute.xlu0 %667 }
  0xe9   :  { %3601 = vst [vmem:[#allocation21_spill] sm:$0xff] %v2485_v49 }
  0xed   :  { %815 = vrot.lane.b32.xlu2 %v2218_v23, %s1893_s20  ;;  %807 = vrot.lane.b32.xlu1 %v2137_v6, %s1893_s20 }
  0xee   :  { %805 = vrot.lane.b32.xlu0 %v2068_v53, %s1893_s20 }
  0xef   :  { %v2493_v62 = vpop.permute.xlu2 %717  ;;  %v2495_v14 = vpop.permute.xlu1 %675 }
  0xf0   :  { %v2497_v17 = vpop.permute.xlu0 %673 }
  0xf1   :  { %3602 = vst [vmem:[#allocation22_spill] sm:$0xff] %v2497_v17 }
  0xf5   :  { %821 = vrot.lane.b32.xlu2 %v2289_v0, %s1893_s20  ;;  %813 = vrot.lane.b32.xlu1 %v2239_v33, %s1893_s20 }
  0xf6   :  { %811 = vrot.lane.b32.xlu0 %v2108_v32, %s1893_s20 }
  0xf7   :  { %v2505_v8 = vpop.permute.xlu2 %723  ;;  %v2507_v59 = vpop.permute.xlu1 %681 }
  0xf8   :  { %v2509_v20 = vpop.permute.xlu0 %679 }
  0xf9   :  { %3603 = vst [vmem:[#allocation23_spill] sm:$0xff] %v2509_v20 }
  0xfd   :  { %827 = vrot.lane.b32.xlu2 %v2331_v36, %s1893_s20  ;;  %819 = vrot.lane.b32.xlu1 %v2291_v41, %s1893_s20 }
  0xfe   :  { %817 = vrot.lane.b32.xlu0 %v2196_v45, %s1893_s20 }
  0xff   :  { %v2517_v26 = vpop.permute.xlu2 %729  ;;  %v2519_v31 = vpop.permute.xlu1 %687 }
 0x100   :  { %v2521_v30 = vpop.permute.xlu0 %685 }
 0x101   :  { %3604 = vst [vmem:[#allocation24_spill] sm:$0xff] %v2521_v30 }
 0x105   :  { %849 = vrot.lane.b32.xlu2 %v2104_v21, %s1894_s21  ;;  %825 = vrot.lane.b32.xlu1 %v2333_v34, %s1893_s20 }
 0x106   :  { %823 = vrot.lane.b32.xlu0 %v2287_v16, %s1893_s20 }
 0x107   :  { %v2529_v10 = vpop.permute.xlu2 %735  ;;  %v2531_v50 = vpop.permute.xlu1 %709 }
 0x108   :  { %3605 = vst [vmem:[#allocation25_spill] sm:$0xff] %v2531_v50  ;;  %v2533_v24 = vpop.permute.xlu0 %707 }
 0x109   :  { %3606 = vst [vmem:[#allocation26_spill] sm:$0xff] %v2533_v24 }
 0x10d   :  { %855 = vrot.lane.b32.xlu2 %v2137_v6, %s1894_s21  ;;  %831 = vrot.lane.b32.xlu1 %v2342_v9, %s1893_s20 }
 0x10e   :  { %829 = vrot.lane.b32.xlu0 %v2320_v7, %s1893_s20 }
 0x10f   :  { %v2541_v15 = vpop.permute.xlu2 %757  ;;  %v2543_v4 = vpop.permute.xlu1 %715 }
 0x110   :  { %3607 = vst [vmem:[#allocation27_spill] sm:$0xff] %v2541_v15  ;;  %v2545_v29 = vpop.permute.xlu0 %713 }
 0x111   :  { %3608 = vst [vmem:[#allocation28_spill] sm:$0xff] %v2543_v4 }
 0x112   :  { %3609 = vst [vmem:[#allocation29_spill] sm:$0xff] %v2545_v29 }
 0x115   :  { %861 = vrot.lane.b32.xlu2 %v2239_v33, %s1894_s21  ;;  %853 = vrot.lane.b32.xlu1 %v2068_v53, %s1894_s21 }
 0x116   :  { %851 = vrot.lane.b32.xlu0 %v2150_v43, %s1894_s21 }
 0x117   :  { %v2553_v56 = vpop.permute.xlu2 %763  ;;  %v2555_v60 = vpop.permute.xlu1 %721 }
 0x118   :  { %3610 = vst [vmem:[#allocation30_spill] sm:$0xff] %v2553_v56  ;;  %v2557_v25 = vpop.permute.xlu0 %719 }
 0x119   :  { %3611 = vst [vmem:[#allocation31_spill] sm:$0xff] %v2555_v60 }
 0x11a   :  { %3612 = vst [vmem:[#allocation32_spill] sm:$0xff] %v2557_v25 }
 0x11d   :  { %867 = vrot.lane.b32.xlu2 %v2291_v41, %s1894_s21  ;;  %859 = vrot.lane.b32.xlu1 %v2108_v32, %s1894_s21 }
 0x11e   :  { %857 = vrot.lane.b32.xlu0 %v2036_v28, %s1894_s21 }
 0x11f   :  { %v2565_v55 = vpop.permute.xlu2 %769  ;;  %v2567_v48 = vpop.permute.xlu1 %727 }
 0x120   :  { %3613 = vst [vmem:[#allocation33_spill] sm:$0xff] %v2565_v55  ;;  %v2569_v27 = vpop.permute.xlu0 %725 }
 0x121   :  { %3614 = vst [vmem:[#allocation34_spill] sm:$0xff] %v2567_v48 }
 0x122   :  { %3615 = vst [vmem:[#allocation35_spill] sm:$0xff] %v2569_v27 }
 0x125   :  { %873 = vrot.lane.b32.xlu2 %v2333_v34, %s1894_s21  ;;  %865 = vrot.lane.b32.xlu1 %v2196_v45, %s1894_s21 }
 0x126   :  { %863 = vrot.lane.b32.xlu0 %v2218_v23, %s1894_s21 }
 0x127   :  { %v2577_v1 = vpop.permute.xlu2 %775  ;;  %v2579_v54 = vpop.permute.xlu1 %733 }
 0x128   :  { %3616 = vst [vmem:[#allocation36_spill] sm:$0xff] %v2577_v1  ;;  %v2581_v19 = vpop.permute.xlu0 %731 }
 0x129   :  { %3617 = vst [vmem:[#allocation37_spill] sm:$0xff] %v2579_v54 }
 0x12a   :  { %3618 = vst [vmem:[#allocation38_spill] sm:$0xff] %v2581_v19 }
 0x12d   :  { %879 = vrot.lane.b32.xlu2 %v2342_v9, %s1894_s21  ;;  %871 = vrot.lane.b32.xlu1 %v2287_v16, %s1894_s21 }
 0x12e   :  { %869 = vrot.lane.b32.xlu0 %v2289_v0, %s1894_s21 }
 0x12f   :  { %v2589_v27 = vpop.permute.xlu2 %781  ;;  %v2591_v25 = vpop.permute.xlu1 %755 }
 0x130   :  { %3619 = vst [vmem:[#allocation39_spill] sm:$0xff] %v2589_v27  ;;  %v2593_v39 = vpop.permute.xlu0 %753 }
 0x131   :  { %3620 = vst [vmem:[#allocation40_spill] sm:$0xff] %v2591_v25 }
 0x135   :  { %901 = vrot.lane.b32.xlu2 %v2068_v53, %s1895_s22  ;;  %877 = vrot.lane.b32.xlu1 %v2320_v7, %s1894_s21 }
 0x136   :  { %875 = vrot.lane.b32.xlu0 %v2331_v36, %s1894_s21 }
 0x137   :  { %v2601_v19 = vpop.permute.xlu2 %803  ;;  %v2603_v61 = vpop.permute.xlu1 %761 }
 0x138   :  { %3621 = vst [vmem:[#allocation41_spill] sm:$0xff] %v2601_v19  ;;  %v2605_v29 = vpop.permute.xlu0 %759 }
 0x139   :  { %3622 = vst [vmem:[#allocation42_spill] sm:$0xff] %v2603_v61 }
 0x13d   :  { %907 = vrot.lane.b32.xlu2 %v2108_v32, %s1895_s22  ;;  %899 = vrot.lane.b32.xlu1 %v2150_v43, %s1895_s22 }
 0x13e   :  { %897 = vrot.lane.b32.xlu0 %v2104_v21, %s1895_s22 }
 0x13f   :  { %v2613_v35 = vpop.permute.xlu2 %809  ;;  %v2615_v52 = vpop.permute.xlu1 %767 }
 0x140   :  { %3623 = vst [vmem:[#allocation43_spill] sm:$0xff] %v2613_v35  ;;  %v2617_v25 = vpop.permute.xlu0 %765 }
 0x141   :  { %3624 = vst [vmem:[#allocation44_spill] sm:$0xff] %v2615_v52 }
 0x145   :  { %913 = vrot.lane.b32.xlu2 %v2196_v45, %s1895_s22  ;;  %905 = vrot.lane.b32.xlu1 %v2036_v28, %s1895_s22 }
 0x146   :  { %903 = vrot.lane.b32.xlu0 %v2137_v6, %s1895_s22 }
 0x147   :  { %v2625_v61 = vpop.permute.xlu2 %815  ;;  %v2627_v19 = vpop.permute.xlu1 %773 }
 0x148   :  { %3625 = vst [vmem:[#allocation45_spill] sm:$0xff] %v2625_v61  ;;  %v2629_v24 = vpop.permute.xlu0 %771 }
 0x149   :  { %3626 = vst [vmem:[#allocation46_spill] sm:$0xff] %v2627_v19 }
 0x14d   :  { %919 = vrot.lane.b32.xlu2 %v2287_v16, %s1895_s22  ;;  %911 = vrot.lane.b32.xlu1 %v2218_v23, %s1895_s22 }
 0x14e   :  { %909 = vrot.lane.b32.xlu0 %v2239_v33, %s1895_s22 }
 0x14f   :  { %v2637_v52 = vpop.permute.xlu2 %821  ;;  %v2639_v35 = vpop.permute.xlu1 %779 }
 0x150   :  { %3627 = vst [vmem:[#allocation47_spill] sm:$0xff] %v2637_v52  ;;  %v2641_v40 = vpop.permute.xlu0 %777 }
 0x151   :  { %3628 = vst [vmem:[#allocation48_spill] sm:$0xff] %v2639_v35 }
 0x155   :  { %925 = vrot.lane.b32.xlu2 %v2320_v7, %s1895_s22  ;;  %917 = vrot.lane.b32.xlu1 %v2289_v0, %s1895_s22 }
 0x156   :  { %915 = vrot.lane.b32.xlu0 %v2291_v41, %s1895_s22 }
 0x157   :  { %v2649_v19 = vpop.permute.xlu2 %827  ;;  %v2651_v61 = vpop.permute.xlu1 %801 }
 0x158   :  { %3629 = vst [vmem:[#allocation49_spill] sm:$0xff] %v2649_v19  ;;  %v2653_v51 = vpop.permute.xlu0 %783 }
 0x15d   :  { %947 = vrot.lane.b32.xlu2 %v2150_v43, %s1896_s23  ;;  %923 = vrot.lane.b32.xlu1 %v2331_v36, %s1895_s22 }
 0x15e   :  { %921 = vrot.lane.b32.xlu0 %v2333_v34, %s1895_s22 }
 0x15f   :  { %v2661_v35 = vpop.permute.xlu2 %849  ;;  %v2663_v52 = vpop.permute.xlu1 %807 }
 0x160   :  { %v2665_v27 = vpop.permute.xlu0 %805 }
 0x161   :  { %3630 = vst [vmem:[#allocation50_spill] sm:$0xff] %v2665_v27 }
 0x165   :  { %953 = vrot.lane.b32.xlu2 %v2036_v28, %s1896_s23  ;;  %945 = vrot.lane.b32.xlu1 %v2104_v21, %s1896_s23 }
 0x166   :  { %927 = vrot.lane.b32.xlu0 %v2342_v9, %s1895_s22 }
 0x167   :  { %v2673_v19 = vpop.permute.xlu2 %855  ;;  %v2675_v54 = vpop.permute.xlu1 %813 }
 0x168   :  { %v2677_v3 = vpop.permute.xlu0 %811 }
 0x169   :  { %3631 = vst [vmem:[#allocation51_spill] sm:$0xff] %v2677_v3 }
 0x16d   :  { %959 = vrot.lane.b32.xlu2 %v2218_v23, %s1896_s23  ;;  %951 = vrot.lane.b32.xlu1 %v2137_v6, %s1896_s23 }
 0x16e   :  { %949 = vrot.lane.b32.xlu0 %v2068_v53, %s1896_s23 }
 0x16f   :  { %v2685_v30 = vpop.permute.xlu2 %861  ;;  %v2687_v1 = vpop.permute.xlu1 %819 }
 0x170   :  { %v2689_v48 = vpop.permute.xlu0 %817 }
 0x171   :  { %3632 = vst [vmem:[#allocation52_spill] sm:$0xff] %v2689_v48 }
 0x175   :  { %965 = vrot.lane.b32.xlu2 %v2289_v0, %s1896_s23  ;;  %957 = vrot.lane.b32.xlu1 %v2239_v33, %s1896_s23 }
 0x176   :  { %955 = vrot.lane.b32.xlu0 %v2108_v32, %s1896_s23 }
 0x177   :  { %v2697_v37 = vpop.permute.xlu2 %867  ;;  %v2699_v20 = vpop.permute.xlu1 %825 }
 0x178   :  { %v2701_v55 = vpop.permute.xlu0 %823 }
 0x179   :  { %3633 = vst [vmem:[#allocation53_spill] sm:$0xff] %v2701_v55 }
 0x17d   :  { %971 = vrot.lane.b32.xlu2 %v2331_v36, %s1896_s23  ;;  %963 = vrot.lane.b32.xlu1 %v2291_v41, %s1896_s23 }
 0x17e   :  { %961 = vrot.lane.b32.xlu0 %v2196_v45, %s1896_s23 }
 0x17f   :  { %v2709_v48 = vpop.permute.xlu2 %873  ;;  %v2711_v60 = vpop.permute.xlu1 %831 }
 0x180   :  { %v2713_v12 = vpop.permute.xlu0 %829 }
 0x181   :  { %3634 = vst [vmem:[#allocation54_spill] sm:$0xff] %v2713_v12 }
 0x185   :  { %993 = vrot.lane.b32.xlu2 %v2104_v21, %s1897_s24  ;;  %969 = vrot.lane.b32.xlu1 %v2333_v34, %s1896_s23 }
 0x186   :  { %967 = vrot.lane.b32.xlu0 %v2287_v16, %s1896_s23 }
 0x187   :  { %v2721_v55 = vpop.permute.xlu2 %879  ;;  %v2723_v17 = vpop.permute.xlu1 %853 }
 0x188   :  { %3635 = vst [vmem:[#allocation55_spill] sm:$0xff] %v2723_v17  ;;  %v2725_v3 = vpop.permute.xlu0 %851 }
 0x189   :  { %3636 = vst [vmem:[#allocation56_spill] sm:$0xff] %v2725_v3 }
 0x18d   :  { %999 = vrot.lane.b32.xlu2 %v2137_v6, %s1897_s24  ;;  %975 = vrot.lane.b32.xlu1 %v2342_v9, %s1896_s23 }
 0x18e   :  { %973 = vrot.lane.b32.xlu0 %v2320_v7, %s1896_s23 }
 0x18f   :  { %v2733_v12 = vpop.permute.xlu2 %901  ;;  %v2735_v56 = vpop.permute.xlu1 %859 }
 0x190   :  { %3637 = vst [vmem:[#allocation57_spill] sm:$0xff] %v2733_v12  ;;  %v2737_v4 = vpop.permute.xlu0 %857 }
 0x191   :  { %3638 = vst [vmem:[#allocation58_spill] sm:$0xff] %v2735_v56 }
 0x192   :  { %3639 = vst [vmem:[#allocation59_spill] sm:$0xff] %v2737_v4 }
 0x195   :  { %1005 = vrot.lane.b32.xlu2 %v2239_v33, %s1897_s24  ;;  %997 = vrot.lane.b32.xlu1 %v2068_v53, %s1897_s24 }
 0x196   :  { %995 = vrot.lane.b32.xlu0 %v2150_v43, %s1897_s24 }
 0x197   :  { %v2745_v3 = vpop.permute.xlu2 %907  ;;  %v2747_v57 = vpop.permute.xlu1 %865 }
 0x198   :  { %3640 = vst [vmem:[#allocation60_spill] sm:$0xff] %v2745_v3  ;;  %v2749_v49 = vpop.permute.xlu0 %863 }
 0x199   :  { %3641 = vst [vmem:[#allocation61_spill] sm:$0xff] %v2747_v57 }
 0x19a   :  { %3642 = vst [vmem:[#allocation62_spill] sm:$0xff] %v2749_v49 }
 0x19d   :  { %1011 = vrot.lane.b32.xlu2 %v2291_v41, %s1897_s24  ;;  %1003 = vrot.lane.b32.xlu1 %v2108_v32, %s1897_s24 }
 0x19e   :  { %1001 = vrot.lane.b32.xlu0 %v2036_v28, %s1897_s24 }
 0x19f   :  { %v2757_v4 = vpop.permute.xlu2 %913  ;;  %v2759_v56 = vpop.permute.xlu1 %871 }
 0x1a0   :  { %3643 = vst [vmem:[#allocation63_spill] sm:$0xff] %v2757_v4  ;;  %v2761_v12 = vpop.permute.xlu0 %869 }
 0x1a1   :  { %3644 = vst [vmem:[#allocation64_spill] sm:$0xff] %v2759_v56 }
 0x1a2   :  { %3645 = vst [vmem:[#allocation65_spill] sm:$0xff] %v2761_v12 }
 0x1a5   :  { %1017 = vrot.lane.b32.xlu2 %v2333_v34, %s1897_s24  ;;  %1009 = vrot.lane.b32.xlu1 %v2196_v45, %s1897_s24 }
 0x1a6   :  { %1007 = vrot.lane.b32.xlu0 %v2218_v23, %s1897_s24 }
 0x1a7   :  { %v2769_v49 = vpop.permute.xlu2 %919  ;;  %v2771_v57 = vpop.permute.xlu1 %877 }
 0x1a8   :  { %3646 = vst [vmem:[#allocation66_spill] sm:$0xff] %v2769_v49  ;;  %v2773_v3 = vpop.permute.xlu0 %875 }
 0x1a9   :  { %3647 = vst [vmem:[#allocation67_spill] sm:$0xff] %v2771_v57 }
 0x1aa   :  { %3648 = vst [vmem:[#allocation68_spill] sm:$0xff] %v2773_v3 }
 0x1ad   :  { %1023 = vrot.lane.b32.xlu2 %v2342_v9, %s1897_s24  ;;  %1015 = vrot.lane.b32.xlu1 %v2287_v16, %s1897_s24 }
 0x1ae   :  { %1013 = vrot.lane.b32.xlu0 %v2289_v0, %s1897_s24 }
 0x1af   :  { %v2781_v12 = vpop.permute.xlu2 %925  ;;  %v2783_v56 = vpop.permute.xlu1 %899 }
 0x1b0   :  { %3649 = vst [vmem:[#allocation69_spill] sm:$0xff] %v2781_v12  ;;  %v898_v4 = vpop.permute.xlu0 %897 }
 0x1b1   :  { %3650 = vst [vmem:[#allocation70_spill] sm:$0xff] %v2783_v56 }
 0x1b5   :  { %1045 = vrot.lane.b32.xlu2 %v2068_v53, %s1898_s25  ;;  %1021 = vrot.lane.b32.xlu1 %v2320_v7, %s1897_s24 }
 0x1b6   :  { %1019 = vrot.lane.b32.xlu0 %v2331_v36, %s1897_s24 }
 0x1b7   :  { %v2791_v3 = vpop.permute.xlu2 %947  ;;  %v2793_v57 = vpop.permute.xlu1 %905 }
 0x1b8   :  { %3651 = vst [vmem:[#allocation71_spill] sm:$0xff] %v2791_v3  ;;  %v904_v49 = vpop.permute.xlu0 %903 }
 0x1b9   :  { %3652 = vst [vmem:[#allocation72_spill] sm:$0xff] %v2793_v57 }
 0x1bd   :  { %1051 = vrot.lane.b32.xlu2 %v2108_v32, %s1898_s25  ;;  %1043 = vrot.lane.b32.xlu1 %v2150_v43, %s1898_s25 }
 0x1be   :  { %1041 = vrot.lane.b32.xlu0 %v2104_v21, %s1898_s25 }
 0x1bf   :  { %v2801_v56 = vpop.permute.xlu2 %953  ;;  %v2803_v12 = vpop.permute.xlu1 %911 }
 0x1c0   :  { %3653 = vst [vmem:[#allocation73_spill] sm:$0xff] %v2801_v56  ;;  %v2805_v17 = vpop.permute.xlu0 %909 }
 0x1c1   :  { %3654 = vst [vmem:[#allocation74_spill] sm:$0xff] %v2803_v12 }
 0x1c5   :  { %1057 = vrot.lane.b32.xlu2 %v2196_v45, %s1898_s25  ;;  %1049 = vrot.lane.b32.xlu1 %v2036_v28, %s1898_s25 }
 0x1c6   :  { %1047 = vrot.lane.b32.xlu0 %v2137_v6, %s1898_s25 }
 0x1c7   :  { %v2813_v57 = vpop.permute.xlu2 %959  ;;  %v2815_v3 = vpop.permute.xlu1 %917 }
 0x1c8   :  { %3655 = vst [vmem:[#allocation75_spill] sm:$0xff] %v2813_v57  ;;  %v2817_v27 = vpop.permute.xlu0 %915 }
 0x1c9   :  { %3656 = vst [vmem:[#allocation76_spill] sm:$0xff] %v2815_v3 }
 0x1cd   :  { %1063 = vrot.lane.b32.xlu2 %v2287_v16, %s1898_s25  ;;  %1055 = vrot.lane.b32.xlu1 %v2218_v23, %s1898_s25 }
 0x1ce   :  { %1053 = vrot.lane.b32.xlu0 %v2239_v33, %s1898_s25 }
 0x1cf   :  { %v2825_v12 = vpop.permute.xlu2 %965  ;;  %v2827_v56 = vpop.permute.xlu1 %923 }
 0x1d0   :  { %3657 = vst [vmem:[#allocation77_spill] sm:$0xff] %v2825_v12  ;;  %v2829_v15 = vpop.permute.xlu0 %921 }
 0x1d1   :  { %3658 = vst [vmem:[#allocation78_spill] sm:$0xff] %v2827_v56  ;;  %v1138_v56 = vsel %vm1137_vm5, %v2393_v42, %v2459_v44 }
 0x1d2   :  { %v1155_v12 = vsel %vm1154_vm4, %v1138_v56, %v2469_v2 }
 0x1d5   :  { %1069 = vrot.lane.b32.xlu2 %v2320_v7, %s1898_s25  ;;  %1061 = vrot.lane.b32.xlu1 %v2289_v0, %s1898_s25  ;;  %v1172_v7 = vsel %vm1171_vm6, %v1155_v12, %v2593_v39 }
 0x1d6   :  { %1059 = vrot.lane.b32.xlu0 %v2291_v41, %s1898_s25 }
 0x1d7   :  { %v2837_v3 = vpop.permute.xlu2 %971  ;;  %v946_v57 = vpop.permute.xlu1 %945 }
 0x1d8   :  { %3659 = vst [vmem:[#allocation79_spill] sm:$0xff] %v2837_v3  ;;  %v2839_v16 = vpop.permute.xlu0 %927  ;;  %v1189_v3 = vsel %vm1188_vm8, %v1172_v7, %v2651_v61 }
 0x1d9   :  { %v1206_v50 = vsel %vm1205_vm7, %v1189_v3, %v2661_v35 }
 0x1da   :  { %v1223_v42 = vsel %vm1222_vm9, %v1206_v50, %v898_v4 }
 0x1db   :  { %v1240_v7 = vsel %vm1239_vm11, %v1223_v42, %v946_v57 }
 0x1dd   :  { %1091 = vrot.lane.b32.xlu2 %v2150_v43, %s1899_s26  ;;  %1067 = vrot.lane.b32.xlu1 %v2331_v36, %s1898_s25  ;;  %v1141_v43 = vsel %vm1137_vm5, %v2403_v46, %v2471_v13 }
 0x1de   :  { %1065 = vrot.lane.b32.xlu0 %v2333_v34, %s1898_s25  ;;  %v1158_v61 = vsel %vm1154_vm4, %v1141_v43, %v2481_v11  ;;  %v3663_v43 = vld [vmem:[#allocation55_spill] sm:$0xff] }
 0x1df   :  { %v994_v12 = vpop.permute.xlu2 %993  ;;  %v952_v39 = vpop.permute.xlu1 %951  ;;  %v1175_v44 = vsel %vm1171_vm6, %v1158_v61, %v2605_v29 }
 0x1e0   :  { %v2860_v35 = vpop.permute.xlu0 %949  ;;  %v2863_v3 = vsel %vm1256_vm10, %v1240_v7, %v994_v12  ;;  %v1192_v57 = vsel %vm1188_vm8, %v1175_v44, %v2663_v52  ;;  %v3664_v44 = vld [vmem:[#allocation5_spill] sm:$0xff] }
 0x1e1   :  { %v1209_v2 = vsel %vm1205_vm7, %v1192_v57, %v2673_v19  ;;  %v3665_v57 = vld [vmem:[#allocation57_spill] sm:$0xff] }
 0x1e2   :  { %v1226_v50 = vsel %vm1222_vm9, %v1209_v2, %v904_v49 }
 0x1e3   :  { %v1243_v46 = vsel %vm1239_vm11, %v1226_v50, %v952_v39  ;;  %v3662_v39 = vld [vmem:[#allocation50_spill] sm:$0xff] }
 0x1e5   :  { %1097 = vrot.lane.b32.xlu2 %v2036_v28, %s1899_s26  ;;  %1089 = vrot.lane.b32.xlu1 %v2104_v21, %s1899_s26  ;;  %v1144_v28 = vsel %vm1137_vm5, %v2417_v22, %v2483_v18 }
 0x1e6   :  { %1071 = vrot.lane.b32.xlu0 %v2342_v9, %s1898_s25  ;;  %v1161_v19 = vsel %vm1154_vm4, %v1144_v28, %v2493_v62  ;;  %v3666_v28 = vld [vmem:[#allocation21_spill] sm:$0xff] }
 0x1e7   :  { %v1000_v13 = vpop.permute.xlu2 %999  ;;  %v958_v11 = vpop.permute.xlu1 %957  ;;  %v1178_v21 = vsel %vm1171_vm6, %v1161_v19, %v2617_v25 }
 0x1e8   :  { %v2884_v4 = vpop.permute.xlu0 %955  ;;  %v2887_v52 = vsel %vm1256_vm10, %v1243_v46, %v1000_v13  ;;  %v1195_v49 = vsel %vm1188_vm8, %v1178_v21, %v2675_v54  ;;  %v3668_v21 = vld [vmem:[#allocation28_spill] sm:$0xff] }
 0x1e9   :  { %v1212_v29 = vsel %vm1205_vm7, %v1195_v49, %v2685_v30 }
 0x1ea   :  { %v1229_v56 = vsel %vm1222_vm9, %v1212_v29, %v2805_v17  ;;  %v3669_v29 = vld [vmem:[#allocation30_spill] sm:$0xff] }
 0x1eb   :  { %v1246_v22 = vsel %vm1239_vm11, %v1229_v56, %v958_v11 }
 0x1ed   :  { %1103 = vrot.lane.b32.xlu2 %v2218_v23, %s1899_s26  ;;  %1095 = vrot.lane.b32.xlu1 %v2137_v6, %s1899_s26  ;;  %v1147_v23 = vsel %vm1137_vm5, %v2435_v47, %v2495_v14 }
 0x1ee   :  { %1093 = vrot.lane.b32.xlu0 %v2068_v53, %s1899_s26  ;;  %v1164_v17 = vsel %vm1154_vm4, %v1147_v23, %v2505_v8  ;;  %v3672_v23 = vld [vmem:[#allocation6_spill] sm:$0xff] }
 0x1ef   :  { %v1006_v18 = vpop.permute.xlu2 %1005  ;;  %v964_v62 = vpop.permute.xlu1 %963  ;;  %v1181_v6 = vsel %vm1171_vm6, %v1164_v17, %v2629_v24  ;;  %v3673_v17 = vld [vmem:[#allocation60_spill] sm:$0xff] }
 0x1f0   :  { %v2909_v54 = vpop.permute.xlu0 %961  ;;  %v2912_v30 = vsel %vm1256_vm10, %v1246_v22, %v1006_v18  ;;  %v1198_v53 = vsel %vm1188_vm8, %v1181_v6, %v2687_v1  ;;  %v3670_v22 = vld [vmem:[#allocation51_spill] sm:$0xff]  ;;  %v3671_v18 = vld [vmem:[#allocation58_spill] sm:$0xff] }
 0x1f1   :  { %v1215_v25 = vsel %vm1205_vm7, %v1198_v53, %v2697_v37 }
 0x1f2   :  { %v1232_v42 = vsel %vm1222_vm9, %v1215_v25, %v2817_v27 }
 0x1f3   :  { %v1249_v47 = vsel %vm1239_vm11, %v1232_v42, %v964_v62 }
 0x1f5   :  { %1109 = vrot.lane.b32.xlu2 %v2289_v0, %s1899_s26  ;;  %1101 = vrot.lane.b32.xlu1 %v2239_v33, %s1899_s26  ;;  %v1150_v0 = vsel %vm1137_vm5, %v2449_v63, %v2507_v59 }
 0x1f6   :  { %1099 = vrot.lane.b32.xlu0 %v2108_v32, %s1899_s26  ;;  %v1167_v27 = vsel %vm1154_vm4, %v1150_v0, %v2517_v26  ;;  %v1153_v32 = vsel %vm1137_vm5, %v2461_v58, %v2519_v31  ;;  %v3674_v0 = vld [vmem:[#allocation22_spill] sm:$0xff] }
 0x1f7   :  { %v1012_v14 = vpop.permute.xlu2 %1011  ;;  %v970_v8 = vpop.permute.xlu1 %969  ;;  %v1184_v33 = vsel %vm1171_vm6, %v1167_v27, %v2641_v40  ;;  %v1170_v24 = vsel %vm1154_vm4, %v1153_v32, %v2529_v10  ;;  %v3676_v32 = vld [vmem:[#allocation31_spill] sm:$0xff] }
 0x1f8   :  { %v2934_v1 = vpop.permute.xlu0 %967  ;;  %v2937_v37 = vsel %vm1256_vm10, %v1249_v47, %v1012_v14  ;;  %v1201_v7 = vsel %vm1188_vm8, %v1184_v33, %v2699_v20  ;;  %v1187_v12 = vsel %vm1171_vm6, %v1170_v24, %v2653_v51  ;;  %v3677_v24 = vld [vmem:[#allocation33_spill] sm:$0xff] }
 0x1f9   :  { %v1218_v63 = vsel %vm1205_vm7, %v1201_v7, %v2709_v48  ;;  %v1204_v58 = vsel %vm1188_vm8, %v1187_v12, %v2711_v60  ;;  %v3678_v12 = vld [vmem:[#allocation52_spill] sm:$0xff] }
 0x1fa   :  { %v1235_v40 = vsel %vm1222_vm9, %v1218_v63, %v2829_v15  ;;  %v1221_v51 = vsel %vm1205_vm7, %v1204_v58, %v2721_v55  ;;  %v3660_v15 = vld [vmem:[#allocation25_spill] sm:$0xff]  ;;  %v3661_v55 = vld [vmem:[#allocation27_spill] sm:$0xff] }
 0x1fb   :  { %v1252_v59 = vsel %vm1239_vm11, %v1235_v40, %v970_v8  ;;  %v3679_v63 = vld [vmem:[#allocation61_spill] sm:$0xff]  ;;  %v3680_v40 = vld [vmem:[#allocation63_spill] sm:$0xff] }
 0x1fd   :  { %1115 = vrot.lane.b32.xlu2 %v2331_v36, %s1899_s26  ;;  %1107 = vrot.lane.b32.xlu1 %v2291_v41, %s1899_s26  ;;  %v1238_v36 = vsel %vm1222_vm9, %v1221_v51, %v2839_v16 }
 0x1fe   :  { %1105 = vrot.lane.b32.xlu0 %v2196_v45, %s1899_s26  ;;  %v1140_v45 = vsel %vm1137_vm5, %v2391_v38, %v2473_v5 }
 0x1ff   :  { %v1018_v20 = vpop.permute.xlu2 %1017  ;;  %v976_v26 = vpop.permute.xlu1 %975  ;;  %v1157_v60 = vsel %vm1154_vm4, %v1140_v45, %v3660_v15  ;;  %v3681_v15 = vld [vmem:[#allocation23_spill] sm:$0xff] }
 0x200   :  { %v2972_v31 = vpop.permute.xlu0 %973  ;;  %v2975_v10 = vsel %vm1256_vm10, %v1252_v59, %v1018_v20  ;;  %v1255_v41 = vsel %vm1239_vm11, %v1238_v36, %v976_v26  ;;  %v1174_v48 = vsel %vm1171_vm6, %v1157_v60, %v3661_v55  ;;  %v3682_v60 = vld [vmem:[#allocation10_spill] sm:$0xff] }
 0x201   :  { %v1191_v16 = vsel %vm1188_vm8, %v1174_v48, %v3662_v39  ;;  %v1149_v55 = vsel %vm1137_vm5, %v3682_v60, %v3681_v15  ;;  %v3683_v48 = vld [vmem:[#allocation34_spill] sm:$0xff] }
 0x202   :  { %v1208_v61 = vsel %vm1205_vm7, %v1191_v16, %v3663_v43  ;;  %v1166_v39 = vsel %vm1154_vm4, %v1149_v55, %v3683_v48  ;;  %v3684_v16 = vld [vmem:[#allocation36_spill] sm:$0xff]  ;;  %v3701_v15 = vld [vmem:[#allocation70_spill] sm:$0xff]  ;;  %v3702_v55 = vld [vmem:[#allocation71_spill] sm:$0xff] }
 0x203   :  { %v1225_v38 = vsel %vm1222_vm9, %v1208_v61, %v3665_v57  ;;  %v1183_v43 = vsel %vm1171_vm6, %v1166_v39, %v3684_v16  ;;  %v3685_v61 = vld [vmem:[#allocation53_spill] sm:$0xff]  ;;  %v3703_v16 = vld [vmem:[#allocation15_spill] sm:$0xff] }
 0x204   :  { %v1242_v2 = vsel %vm1239_vm11, %v1225_v38, %v2860_v35  ;;  %v3687_v38 = vld [vmem:[#allocation66_spill] sm:$0xff] }
 0x205   :  { %1113 = vrot.lane.b32.xlu1 %v2333_v34, %s1899_s26  ;;  %v3667_v34 = vld [vmem:[#allocation8_spill] sm:$0xff] }
 0x206   :  { %1111 = vrot.lane.b32.xlu0 %v3664_v44, %s1899_s26  ;;  %v1143_v19 = vsel %vm1137_vm5, %v3667_v34, %v3666_v28  ;;  %v3686_v44 = vld [vmem:[#allocation64_spill] sm:$0xff] }
 0x207   :  { %v1024_v5 = vpop.permute.xlu2 %1023  ;;  %v998_v50 = vpop.permute.xlu1 %997  ;;  %v1160_v49 = vsel %vm1154_vm4, %v1143_v19, %v3668_v21  ;;  %v3688_v21 = vld [vmem:[#allocation24_spill] sm:$0xff] }
 0x208   :  { %v2997_v46 = vpop.permute.xlu0 %995  ;;  %v3000_v13 = vsel %vm1256_vm10, %v1255_v41, %v1024_v5  ;;  %v1259_v11 = vsel %vm1256_vm10, %v1242_v2, %v998_v50  ;;  %v1177_v56 = vsel %vm1171_vm6, %v1160_v49, %v3669_v29  ;;  %v3689_v49 = vld [vmem:[#allocation11_spill] sm:$0xff] }
 0x209   :  { %v1194_v35 = vsel %vm1188_vm8, %v1177_v56, %v3670_v22  ;;  %v1152_v29 = vsel %vm1137_vm5, %v3689_v49, %v3688_v21  ;;  %v3690_v56 = vld [vmem:[#allocation37_spill] sm:$0xff]  ;;  %v3708_v49 = vld [vmem:[#allocation59_spill] sm:$0xff] }
 0x20a   :  { %v1211_v62 = vsel %vm1205_vm7, %v1194_v35, %v3671_v18  ;;  %v1169_v22 = vsel %vm1154_vm4, %v1152_v29, %v3690_v56  ;;  %v3691_v35 = vld [vmem:[#allocation39_spill] sm:$0xff]  ;;  %v3709_v56 = vld [vmem:[#allocation72_spill] sm:$0xff] }
 0x20b   :  { %v1228_v6 = vsel %vm1222_vm9, %v1211_v62, %v3673_v17  ;;  %v1186_v18 = vsel %vm1171_vm6, %v1169_v22, %v3691_v35  ;;  %v3692_v62 = vld [vmem:[#allocation54_spill] sm:$0xff]  ;;  %v3710_v35 = vld [vmem:[#allocation73_spill] sm:$0xff] }
 0x20c   :  { %v1245_v25 = vsel %vm1239_vm11, %v1228_v6, %v2884_v4  ;;  %v3694_v6 = vld [vmem:[#allocation69_spill] sm:$0xff] }
 0x20d   :  { %1119 = vrot.lane.b32.xlu1 %v2342_v9, %s1899_s26  ;;  %v3675_v9 = vld [vmem:[#allocation9_spill] sm:$0xff] }
 0x20e   :  { %1117 = vrot.lane.b32.xlu0 %v3672_v23, %s1899_s26  ;;  %v1146_v27 = vsel %vm1137_vm5, %v3675_v9, %v3674_v0  ;;  %v3693_v23 = vld [vmem:[#allocation67_spill] sm:$0xff] }
 0x20f   :  { %v1046_v53 = vpop.permute.xlu2 %1045  ;;  %v1004_v42 = vpop.permute.xlu1 %1003  ;;  %v1163_v33 = vsel %vm1154_vm4, %v1146_v27, %v3676_v32  ;;  %v3695_v32 = vld [vmem:[#allocation13_spill] sm:$0xff] }
 0x210   :  { %v3022_v47 = vpop.permute.xlu0 %1001  ;;  %v3025_v14 = vsel %vm1273_vm12, %v1259_v11, %v1046_v53  ;;  %v1262_v8 = vsel %vm1256_vm10, %v1245_v25, %v1004_v42  ;;  %v1180_v7 = vsel %vm1171_vm6, %v1163_v33, %v3677_v24  ;;  %v3696_v33 = vld [vmem:[#allocation12_spill] sm:$0xff] }
 0x211   :  { %v1197_v4 = vsel %vm1188_vm8, %v1180_v7, %v3678_v12  ;;  %v1139_v24 = vsel %vm1137_vm5, %v3696_v33, %v3695_v32  ;;  %v3697_v12 = vld [vmem:[#allocation26_spill] sm:$0xff]  ;;  %v3714_v33 = vld [vmem:[#allocation44_spill] sm:$0xff] }
 0x212   :  { %v1214_v58 = vsel %vm1205_vm7, %v1197_v4, %v3679_v63  ;;  %v1156_v4 = vsel %vm1154_vm4, %v1139_v24, %v3697_v12  ;;  %v3716_v12 = vld [vmem:[#allocation62_spill] sm:$0xff] }
 0x213   :  { %v1231_v51 = vsel %vm1222_vm9, %v1214_v58, %v3680_v40  ;;  %v3698_v40 = vld [vmem:[#allocation40_spill] sm:$0xff] }
 0x214   :  { %v1248_v20 = vsel %vm1239_vm11, %v1231_v51, %v2909_v54  ;;  %v1200_v54 = vsel %vm1188_vm8, %v1183_v43, %v3685_v61  ;;  %v1173_v51 = vsel %vm1171_vm6, %v1156_v4, %v3698_v40  ;;  %v3704_v43 = vld [vmem:[#allocation7_spill] sm:$0xff] }
 0x215   :  { %v1217_v57 = vsel %vm1205_vm7, %v1200_v54, %v3686_v44  ;;  %v1142_v61 = vsel %vm1137_vm5, %v3704_v43, %v3703_v16 }
 0x216   :  { %v1234_v5 = vsel %vm1222_vm9, %v1217_v57, %v3687_v38  ;;  %v3705_v57 = vld [vmem:[#allocation29_spill] sm:$0xff] }
 0x217   :  { %v1052_v59 = vpop.permute.xlu2 %1051  ;;  %v1010_v36 = vpop.permute.xlu1 %1009  ;;  %v1251_v50 = vsel %vm1239_vm11, %v1234_v5, %v2934_v1  ;;  %v1203_v1 = vsel %vm1188_vm8, %v1186_v18, %v3692_v62  ;;  %v1159_v38 = vsel %vm1154_vm4, %v1142_v61, %v3705_v57 }
 0x218   :  { %v3043_v26 = vpop.permute.xlu0 %1007  ;;  %v3046_v41 = vsel %vm1273_vm12, %v1262_v8, %v1052_v59  ;;  %v1265_v45 = vsel %vm1256_vm10, %v1248_v20, %v1010_v36  ;;  %v1220_v17 = vsel %vm1205_vm7, %v1203_v1, %v3693_v23  ;;  %v3699_v59 = vld [vmem:[#allocation41_spill] sm:$0xff]  ;;  %v3700_v36 = vld [vmem:[#allocation56_spill] sm:$0xff]  ;;  %v3712_v23 = vld [vmem:[#allocation14_spill] sm:$0xff] }
 0x219   :  { %v1237_v53 = vsel %vm1222_vm9, %v1220_v17, %v3694_v6  ;;  %v1190_v20 = vsel %vm1188_vm8, %v1173_v51, %v3699_v59  ;;  %v3711_v1 = vld [vmem:[#allocation17_spill] sm:$0xff]  ;;  %v3718_v51 = vld [vmem:[#allocation75_spill] sm:$0xff] }
 0x21a   :  { %v1254_v42 = vsel %vm1239_vm11, %v1237_v53, %v2972_v31  ;;  %v1145_v17 = vsel %vm1137_vm5, %v3712_v23, %v3711_v1 }
 0x21f   :  { %v1058_v2 = vpop.permute.xlu2 %1057  ;;  %v1016_v11 = vpop.permute.xlu1 %1015 }
 0x220   :  { %v3064_v28 = vpop.permute.xlu0 %1013  ;;  %v3067_v34 = vsel %vm1273_vm12, %v1265_v45, %v1058_v2  ;;  %v1268_v19 = vsel %vm1256_vm10, %v1251_v50, %v1016_v11  ;;  %v1207_v45 = vsel %vm1205_vm7, %v1190_v20, %v3700_v36  ;;  %v3706_v11 = vld [vmem:[#allocation42_spill] sm:$0xff] }
 0x221   :  { %v1224_v60 = vsel %vm1222_vm9, %v1207_v45, %v3701_v15  ;;  %v3719_v36 = vld [vmem:[#allocation18_spill] sm:$0xff]  ;;  %v3720_v45 = vld [vmem:[#allocation16_spill] sm:$0xff] }
 0x222   :  { %v1241_v48 = vsel %vm1239_vm11, %v1224_v60, %v3702_v55  ;;  %v1148_v15 = vsel %vm1137_vm5, %v3720_v45, %v3719_v36 }
 0x223   :  { %v1258_v39 = vsel %vm1256_vm10, %v1241_v48, %v2997_v46  ;;  %v3707_v46 = vld [vmem:[#allocation43_spill] sm:$0xff] }
 0x224   :  { %v3721_v48 = vld [vmem:[#allocation35_spill] sm:$0xff] }
 0x227   :  { %v1064_v25 = vpop.permute.xlu2 %1063  ;;  %v1022_v8 = vpop.permute.xlu1 %1021 }
 0x228   :  { %v3085_v0 = vpop.permute.xlu0 %1019  ;;  %v3088_v9 = vsel %vm1273_vm12, %v1268_v19, %v1064_v25  ;;  %v1271_v27 = vsel %vm1256_vm10, %v1254_v42, %v1022_v8  ;;  %v1176_v19 = vsel %vm1171_vm6, %v1159_v38, %v3706_v11  ;;  %v3713_v25 = vld [vmem:[#allocation32_spill] sm:$0xff]  ;;  %v3724_v38 = vld [vmem:[#allocation65_spill] sm:$0xff] }
 0x229   :  { %v1193_v21 = vsel %vm1188_vm8, %v1176_v19, %v3707_v46  ;;  %v1162_v42 = vsel %vm1154_vm4, %v1145_v17, %v3713_v25  ;;  %v3725_v11 = vld [vmem:[#allocation76_spill] sm:$0xff]  ;;  %v3726_v46 = vld [vmem:[#allocation77_spill] sm:$0xff] }
 0x22a   :  { %v1210_v29 = vsel %vm1205_vm7, %v1193_v21, %v3708_v49  ;;  %v1179_v24 = vsel %vm1171_vm6, %v1162_v42, %v3714_v33 }
 0x22b   :  { %v1227_v22 = vsel %vm1222_vm9, %v1210_v29, %v3709_v56  ;;  %v3727_v29 = vld [vmem:[#allocation20_spill] sm:$0xff]  ;;  %v3728_v56 = vld [vmem:[#allocation19_spill] sm:$0xff] }
 0x22c   :  { %v1244_v18 = vsel %vm1239_vm11, %v1227_v22, %v3710_v35  ;;  %v1151_v22 = vsel %vm1137_vm5, %v3728_v56, %v3727_v29 }
 0x22d   :  { %v1261_v62 = vsel %vm1256_vm10, %v1244_v18, %v3022_v47  ;;  %v3715_v47 = vld [vmem:[#allocation45_spill] sm:$0xff] }
 0x22f   :  { %v1070_v7 = vpop.permute.xlu2 %1069  ;;  %v1044_v63 = vpop.permute.xlu1 %1043 }
 0x230   :  { %v3096_v58 = vpop.permute.xlu0 %1041  ;;  %v3099_v31 = vsel %vm1273_vm12, %v1271_v27, %v1070_v7  ;;  %v1275_v54 = vsel %vm1273_vm12, %v1258_v39, %v1044_v63  ;;  %v1196_v7 = vsel %vm1188_vm8, %v1179_v24, %v3715_v47  ;;  %v3717_v63 = vld [vmem:[#allocation74_spill] sm:$0xff]  ;;  %v1165_v39 = vsel %vm1154_vm4, %v1148_v15, %v3721_v48 }
 0x231   :  { %v1213_v4 = vsel %vm1205_vm7, %v1196_v7, %v3716_v12  ;;  %v3733_v24 = vld [vmem:[#allocation78_spill] sm:$0xff]  ;;  %v3734_v7 = vld [vmem:[#allocation79_spill] sm:$0xff] }
 0x232   :  { %v1230_v40 = vsel %vm1222_vm9, %v1213_v4, %v3717_v63 }
 0x233   :  { %v1247_v59 = vsel %vm1239_vm11, %v1230_v40, %v3718_v51  ;;  %v1274_v51 = vsel %vm1273_vm12, %v2863_v3, %v3096_v58 }
 0x234   :  { %v1264_v20 = vsel %vm1256_vm10, %v1247_v59, %v3043_v26  ;;  %v3723_v26 = vld [vmem:[#allocation47_spill] sm:$0xff] }
 0x237   :  { %v1092_v44 = vpop.permute.xlu2 %1091  ;;  %v1050_v5 = vpop.permute.xlu1 %1049 }
 0x238   :  { %v1048_v2 = vpop.permute.xlu0 %1047  ;;  %v3120_v50 = vsel %vm1290_vm13, %v1275_v54, %v1092_v44  ;;  %v1278_v6 = vsel %vm1273_vm12, %v1261_v62, %v1050_v5  ;;  %v3722_v54 = vld [vmem:[#allocation46_spill] sm:$0xff] }
 0x239   :  { %1325 = vrot.lane.b32.xlu0 %v3120_v50, %s1891_s19  ;;  %v1182_v44 = vsel %vm1171_vm6, %v1165_v39, %v3722_v54  ;;  %v3729_v62 = vld [vmem:[#allocation38_spill] sm:$0xff] }
 0x23a   :  { %v1199_v57 = vsel %vm1188_vm8, %v1182_v44, %v3723_v26  ;;  %v1168_v1 = vsel %vm1154_vm4, %v1151_v22, %v3729_v62 }
 0x23b   :  { %v1216_v5 = vsel %vm1205_vm7, %v1199_v57, %v3724_v38 }
 0x23c   :  { %v1233_v19 = vsel %vm1222_vm9, %v1216_v5, %v3725_v11 }
 0x23d   :  { %v1250_v21 = vsel %vm1239_vm11, %v1233_v19, %v3726_v46 }
 0x23e   :  { %v1267_v49 = vsel %vm1256_vm10, %v1250_v21, %v3064_v28  ;;  %v3731_v28 = vld [vmem:[#allocation49_spill] sm:$0xff] }
 0x23f   :  { %v1098_v53 = vpop.permute.xlu2 %1097  ;;  %v1056_v8 = vpop.permute.xlu1 %1055 }
 0x240   :  { %v1054_v27 = vpop.permute.xlu0 %1053  ;;  %v3143_v32 = vsel %vm1290_vm13, %v1278_v6, %v1098_v53  ;;  %v1281_v60 = vsel %vm1273_vm12, %v1264_v20, %v1056_v8  ;;  %v3730_v53 = vld [vmem:[#allocation48_spill] sm:$0xff] }
 0x241   :  { %1331 = vrot.lane.b32.xlu0 %v3143_v32, %s1891_s19  ;;  %v1185_v25 = vsel %vm1171_vm6, %v1168_v1, %v3730_v53  ;;  %v3732_v8 = vld [vmem:[#allocation68_spill] sm:$0xff] }
 0x242   :  { %v1202_v42 = vsel %vm1188_vm8, %v1185_v25, %v3731_v28 }
 0x243   :  { %v1219_v33 = vsel %vm1205_vm7, %v1202_v42, %v3732_v8 }
 0x244   :  { %v1236_v47 = vsel %vm1222_vm9, %v1219_v33, %v3733_v24 }
 0x245   :  { %v1253_v12 = vsel %vm1239_vm11, %v1236_v47, %v3734_v7 }
 0x246   :  { %v1270_v4 = vsel %vm1256_vm10, %v1253_v12, %v3085_v0  ;;  %v1277_v0 = vsel %vm1273_vm12, %v2887_v52, %v1048_v2 }
 0x247   :  { %v1104_v55 = vpop.permute.xlu2 %1103  ;;  %v1062_v16 = vpop.permute.xlu1 %1061 }
 0x248   :  { %v1060_v43 = vpop.permute.xlu0 %1059  ;;  %v3166_v61 = vsel %vm1290_vm13, %v1281_v60, %v1104_v55  ;;  %v1284_v35 = vsel %vm1273_vm12, %v1267_v49, %v1062_v16  ;;  %v1280_v55 = vsel %vm1273_vm12, %v2912_v30, %v1054_v27 }
 0x249   :  { %1337 = vrot.lane.b32.xlu0 %v3166_v61, %s1891_s19 }
 0x24f   :  { %v1110_v18 = vpop.permute.xlu2 %1109  ;;  %v1068_v23 = vpop.permute.xlu1 %1067 }
 0x250   :  { %v1066_v17 = vpop.permute.xlu0 %1065  ;;  %v3189_v6 = vsel %vm1290_vm13, %v1284_v35, %v1110_v18  ;;  %v1287_v63 = vsel %vm1273_vm12, %v1270_v4, %v1068_v23 }
 0x251   :  { %1343 = vrot.lane.b32.xlu0 %v3189_v6, %s1891_s19 }
 0x257   :  { %v1116_v40 = vpop.permute.xlu2 %1115  ;;  %v1090_v59 = vpop.permute.xlu1 %1089 }
 0x258   :  { %v1072_v20 = vpop.permute.xlu0 %1071  ;;  %v3210_v36 = vsel %vm1290_vm13, %v1287_v63, %v1116_v40  ;;  %v3213_v45 = vsel %vm1290_vm13, %v1274_v51, %v1090_v59 }
 0x259   :  { %1349 = vrot.lane.b32.xlu0 %v3210_v36, %s1891_s19  ;;  %1323 = vrot.lane.b32.xlu2 %v3213_v45, %s1891_s19 }
 0x25f   :  { %v1096_v15 = vpop.permute.xlu1 %1095 }
 0x260   :  { %v1094_v60 = vpop.permute.xlu0 %1093  ;;  %v3222_v3 = vsel %vm1290_vm13, %v1277_v0, %v1096_v15 }
 0x261   :  { %v3226_v58 = vsel %vm1290_vm13, %v3025_v14, %v1094_v60  ;;  %1329 = vrot.lane.b32.xlu2 %v3222_v3, %s1891_s19  ;;  %v1283_v14 = vsel %vm1273_vm12, %v2937_v37, %v1060_v43 }
 0x262   :  { %1327 = vrot.lane.b32.xlu1 %v3226_v58, %s1891_s19 }
 0x267   :  { %v1102_v48 = vpop.permute.xlu1 %1101 }
 0x268   :  { %v1100_v52 = vpop.permute.xlu0 %1099  ;;  %v3235_v2 = vsel %vm1290_vm13, %v1280_v55, %v1102_v48 }
 0x269   :  { %v3239_v39 = vsel %vm1290_vm13, %v3046_v41, %v1100_v52  ;;  %1335 = vrot.lane.b32.xlu2 %v3235_v2, %s1891_s19  ;;  %v1286_v41 = vsel %vm1273_vm12, %v2975_v10, %v1066_v17 }
 0x26a   :  { %1333 = vrot.lane.b32.xlu1 %v3239_v39, %s1891_s19 }
 0x26f   :  { %v1108_v16 = vpop.permute.xlu1 %1107 }
 0x270   :  { %v1106_v30 = vpop.permute.xlu0 %1105  ;;  %v3248_v27 = vsel %vm1290_vm13, %v1283_v14, %v1108_v16 }
 0x271   :  { %v3252_v54 = vsel %vm1290_vm13, %v3067_v34, %v1106_v30  ;;  %1341 = vrot.lane.b32.xlu2 %v3248_v27, %s1891_s19  ;;  %v1289_v34 = vsel %vm1273_vm12, %v3000_v13, %v1072_v20 }
 0x272   :  { %1339 = vrot.lane.b32.xlu1 %v3252_v54, %s1891_s19 }
 0x277   :  { %v1114_v44 = vpop.permute.xlu1 %1113 }
 0x278   :  { %v1112_v37 = vpop.permute.xlu0 %1111  ;;  %v3261_v43 = vsel %vm1290_vm13, %v1286_v41, %v1114_v44 }
 0x279   :  { %v3265_v26 = vsel %vm1290_vm13, %v3088_v9, %v1112_v37  ;;  %1347 = vrot.lane.b32.xlu2 %v3261_v43, %s1891_s19 }
 0x27a   :  { %1345 = vrot.lane.b32.xlu1 %v3265_v26, %s1891_s19 }
 0x27f   :  { %v1120_v57 = vpop.permute.xlu1 %1119 }
 0x280   :  { %v1118_v10 = vpop.permute.xlu0 %1117  ;;  %v3274_v38 = vsel %vm1290_vm13, %v1289_v34, %v1120_v57 }
 0x281   :  { %v3278_v5 = vsel %vm1290_vm13, %v3099_v31, %v1118_v10  ;;  %1353 = vrot.lane.b32.xlu2 %v3274_v38, %s1891_s19 }
 0x282   :  { %1351 = vrot.lane.b32.xlu1 %v3278_v5, %s1891_s19 }
 0x2ab   :  { %v1326_v9 = vpop.permute.xlu0 %1325 }
 0x2ac   :  { %v1372_v11 = vadd.f32 %v1326_v9, %v3120_v50 }
 0x2ae   :  { %1405 = vrot.lane.b32.xlu1 %v1372_v11, %s1900_s27 }
 0x2b3   :  { %v1332_v13 = vpop.permute.xlu0 %1331  ;;  %v1324_v19 = vpop.permute.xlu2 %1323 }
 0x2b4   :  { %v3287_v46 = vadd.f32 %v1332_v13, %v3143_v32  ;;  %v1371_v31 = vadd.f32 %v1324_v19, %v3213_v45 }
 0x2b6   :  { %1411 = vrot.lane.b32.xlu1 %v3287_v46, %s1900_s27  ;;  %1403 = vrot.lane.b32.xlu0 %v1371_v31, %s1900_s27 }
 0x2bb   :  { %v1338_v21 = vpop.permute.xlu0 %1337  ;;  %v1330_v49 = vpop.permute.xlu2 %1329 }
 0x2bc   :  { %v3294_v29 = vadd.f32 %v1338_v21, %v3166_v61  ;;  %v1374_v56 = vadd.f32 %v1330_v49, %v3222_v3 }
 0x2be   :  { %1417 = vrot.lane.b32.xlu1 %v3294_v29, %s1900_s27  ;;  %1409 = vrot.lane.b32.xlu0 %v1374_v56, %s1900_s27 }
 0x2c3   :  { %v1344_v22 = vpop.permute.xlu0 %1343  ;;  %v1336_v35 = vpop.permute.xlu2 %1335 }
 0x2c4   :  { %v3301_v18 = vadd.f32 %v1344_v22, %v3189_v6  ;;  %v1377_v62 = vadd.f32 %v1336_v35, %v3235_v2 }
 0x2c6   :  { %1423 = vrot.lane.b32.xlu1 %v3301_v18, %s1900_s27  ;;  %1415 = vrot.lane.b32.xlu0 %v1377_v62, %s1900_s27 }
 0x2cb   :  { %v1350_v1 = vpop.permute.xlu0 %1349  ;;  %v1342_v23 = vpop.permute.xlu2 %1341 }
 0x2cc   :  { %v3308_v17 = vadd.f32 %v1350_v1, %v3210_v36  ;;  %v3311_v53 = vadd.f32 %v1342_v23, %v3248_v27 }
 0x2ce   :  { %1429 = vrot.lane.b32.xlu1 %v3308_v17, %s1900_s27  ;;  %1421 = vrot.lane.b32.xlu0 %v3311_v53, %s1900_s27 }
 0x2d3   :  { %v1348_v25 = vpop.permute.xlu2 %1347 }
 0x2d4   :  { %v1328_v28 = vpop.permute.xlu1 %1327  ;;  %v3318_v42 = vadd.f32 %v1348_v25, %v3261_v43 }
 0x2d5   :  { %v1373_v8 = vadd.f32 %v1328_v28, %v3226_v58  ;;  %v1847_v28 = vld [vmem:[%s3580_s0] sm:$0xff] }
 0x2d6   :  { %1427 = vrot.lane.b32.xlu0 %v3318_v42, %s1900_s27 }
 0x2d7   :  { %1407 = vrot.lane.b32.xlu2 %v1373_v8, %s1900_s27 }
 0x2db   :  { %v1354_v33 = vpop.permute.xlu2 %1353 }
 0x2dc   :  { %v1334_v24 = vpop.permute.xlu1 %1333  ;;  %v3325_v47 = vadd.f32 %v1354_v33, %v3274_v38 }
 0x2dd   :  { %v1376_v7 = vadd.f32 %v1334_v24, %v3239_v39 }
 0x2de   :  { %1433 = vrot.lane.b32.xlu0 %v3325_v47, %s1900_s27 }
 0x2df   :  { %1413 = vrot.lane.b32.xlu2 %v1376_v7, %s1900_s27 }
 0x2e4   :  { %v1340_v12 = vpop.permute.xlu1 %1339 }
 0x2e5   :  { %v1379_v4 = vadd.f32 %v1340_v12, %v3252_v54 }
 0x2e7   :  { %1419 = vrot.lane.b32.xlu2 %v1379_v4, %s1900_s27 }
 0x2ec   :  { %v1346_v63 = vpop.permute.xlu1 %1345 }
 0x2ed   :  { %v1382_v40 = vadd.f32 %v1346_v63, %v3265_v26 }
 0x2ef   :  { %1425 = vrot.lane.b32.xlu2 %v1382_v40, %s1900_s27 }
 0x2f4   :  { %v1352_v51 = vpop.permute.xlu1 %1351 }
 0x2f5   :  { %v3336_v59 = vadd.f32 %v1352_v51, %v3278_v5 }
 0x2f7   :  { %1431 = vrot.lane.b32.xlu2 %v3336_v59, %s1900_s27 }
 0x320   :  { %v1406_v20 = vpop.permute.xlu1 %1405 }
 0x321   :  { %v3340_v0 = vadd.f32 %v1406_v20, %v1372_v11 }
 0x323   :  { %1485 = vrot.lane.b32.xlu2 %v3340_v0, %s1901_s28 }
 0x328   :  { %v1404_v15 = vpop.permute.xlu0 %1403  ;;  %v1412_v16 = vpop.permute.xlu1 %1411 }
 0x329   :  { %v3344_v60 = vadd.f32 %v1404_v15, %v1371_v31  ;;  %v3363_v30 = vadd.f32 %v1412_v16, %v3287_v46 }
 0x32b   :  { %1549 = vrot.lane.b32.xlu2 %v1372_v11, %s1902_s29  ;;  %1483 = vrot.lane.b32.xlu1 %v3344_v60, %s1901_s28 }
 0x330   :  { %v1410_v52 = vpop.permute.xlu0 %1409 }
 0x331   :  { %v1408_v55 = vpop.permute.xlu2 %1407  ;;  %v3356_v14 = vadd.f32 %v1410_v52, %v1374_v56 }
 0x332   :  { %v3349_v48 = vadd.f32 %v1408_v55, %v1373_v8 }
 0x333   :  { %1611 = vrot.lane.b32.xlu2 %v3213_v45, %s1903_s30  ;;  %1547 = vrot.lane.b32.xlu1 %v1371_v31, %s1902_s29 }
 0x334   :  { %1487 = vrot.lane.b32.xlu0 %v3349_v48, %s1901_s28 }
 0x338   :  { %v1416_v44 = vpop.permute.xlu0 %1415 }
 0x339   :  { %v1414_v45 = vpop.permute.xlu2 %1413  ;;  %v3378_v37 = vadd.f32 %v1416_v44, %v1377_v62 }
 0x33a   :  { %v3371_v41 = vadd.f32 %v1414_v45, %v1376_v7 }
 0x33b   :  { %1553 = vrot.lane.b32.xlu2 %v1374_v56, %s1902_s29  ;;  %1551 = vrot.lane.b32.xlu1 %v1373_v8, %s1902_s29 }
 0x33c   :  { %1489 = vrot.lane.b32.xlu0 %v3356_v14, %s1901_s28 }
 0x343   :  { %1555 = vrot.lane.b32.xlu2 %v3287_v46, %s1902_s29  ;;  %1491 = vrot.lane.b32.xlu1 %v3363_v30, %s1901_s28 }
 0x344   :  { %1613 = vrot.lane.b32.xlu0 %v3120_v50, %s1903_s30  ;;  %v1418_v50 = vpop.permute.xlu1 %1417 }
 0x345   :  { %v3386_v34 = vadd.f32 %v1418_v50, %v3294_v29 }
 0x34b   :  { %1557 = vrot.lane.b32.xlu2 %v1376_v7, %s1902_s29  ;;  %1493 = vrot.lane.b32.xlu1 %v3371_v41, %s1901_s28 }
 0x34c   :  { %1615 = vrot.lane.b32.xlu0 %v3226_v58, %s1903_s30  ;;  %v1420_v58 = vpop.permute.xlu2 %1419 }
 0x34d   :  { %v3394_v57 = vadd.f32 %v1420_v58, %v1379_v4 }
 0x353   :  { %1559 = vrot.lane.b32.xlu2 %v1377_v62, %s1902_s29  ;;  %1495 = vrot.lane.b32.xlu1 %v3378_v37, %s1901_s28 }
 0x354   :  { %1617 = vrot.lane.b32.xlu0 %v3222_v3, %s1903_s30  ;;  %v1422_v3 = vpop.permute.xlu0 %1421  ;;  %v1426_v9 = vpop.permute.xlu2 %1425 }
 0x355   :  { %v3402_v10 = vadd.f32 %v1422_v3, %v3311_v53  ;;  %v3419_v13 = vadd.f32 %v1426_v9, %v1382_v40 }
 0x35b   :  { %1561 = vrot.lane.b32.xlu2 %v3294_v29, %s1902_s29  ;;  %1497 = vrot.lane.b32.xlu1 %v3386_v34, %s1901_s28 }
 0x35c   :  { %1619 = vrot.lane.b32.xlu0 %v3143_v32, %s1903_s30  ;;  %v1424_v32 = vpop.permute.xlu1 %1423  ;;  %v1432_v11 = vpop.permute.xlu2 %1431 }
 0x35d   :  { %v1428_v19 = vpop.permute.xlu0 %1427 }
 0x35e   :  { %v3427_v46 = vadd.f32 %v1428_v19, %v3318_v42  ;;  %v1850_v19 = vld [vmem:[%s3580_s0 + $0x18] sm:$0xff] }
 0x363   :  { %1563 = vrot.lane.b32.xlu2 %v1379_v4, %s1902_s29  ;;  %1499 = vrot.lane.b32.xlu1 %v3394_v57, %s1901_s28 }
 0x364   :  { %1621 = vrot.lane.b32.xlu0 %v3239_v39, %s1903_s30  ;;  %v3411_v39 = vadd.f32 %v1424_v32, %v3301_v18  ;;  %v1430_v21 = vpop.permute.xlu1 %1429 }
 0x365   :  { %v3437_v49 = vadd.f32 %v1430_v21, %v3308_v17  ;;  %v1434_v56 = vpop.permute.xlu0 %1433 }
 0x366   :  { %v3455_v22 = vadd.f32 %v1434_v56, %v3325_v47 }
 0x36b   :  { %1565 = vrot.lane.b32.xlu2 %v3311_v53, %s1902_s29  ;;  %1501 = vrot.lane.b32.xlu1 %v3402_v10, %s1901_s28 }
 0x36c   :  { %1623 = vrot.lane.b32.xlu0 %v3235_v2, %s1903_s30 }
 0x373   :  { %1567 = vrot.lane.b32.xlu2 %v3301_v18, %s1902_s29  ;;  %1503 = vrot.lane.b32.xlu1 %v3411_v39, %s1901_s28 }
 0x374   :  { %1625 = vrot.lane.b32.xlu0 %v3166_v61, %s1903_s30 }
 0x37b   :  { %1569 = vrot.lane.b32.xlu2 %v1382_v40, %s1902_s29  ;;  %1505 = vrot.lane.b32.xlu1 %v3419_v13, %s1901_s28 }
 0x37c   :  { %1627 = vrot.lane.b32.xlu0 %v3252_v54, %s1903_s30 }
 0x37d   :  { %v1486_v2 = vpop.permute.xlu2 %1485 }
 0x37e   :  { %v1532_v61 = vadd.f32 %v1486_v2, %v3340_v0 }
 0x383   :  { %1571 = vrot.lane.b32.xlu2 %v3318_v42, %s1902_s29  ;;  %1507 = vrot.lane.b32.xlu1 %v3427_v46, %s1901_s28  ;;  %v1675_v42 = vmul.f32 121.0, %v1847_v28 }
 0x384   :  { %1629 = vrot.lane.b32.xlu0 %v3248_v27, %s1903_s30  ;;  %v3446_v27 = vadd.f32 %v1432_v11, %v3336_v59 }
 0x385   :  { %v1550_v54 = vpop.permute.xlu2 %1549 }
 0x386   :  { %v1596_v31 = vadd.f32 %v1550_v54, %v1532_v61  ;;  %v1678_v61 = vmul.f32 121.0, %v1850_v19 }
 0x38b   :  { %1573 = vrot.lane.b32.xlu2 %v3308_v17, %s1902_s29  ;;  %1509 = vrot.lane.b32.xlu1 %v3437_v49, %s1901_s28 }
 0x38c   :  { %1631 = vrot.lane.b32.xlu0 %v3189_v6, %s1903_s30 }
 0x38d   :  { %v1612_v29 = vpop.permute.xlu2 %1611 }
 0x393   :  { %1575 = vrot.lane.b32.xlu2 %v3336_v59, %s1902_s29  ;;  %1511 = vrot.lane.b32.xlu1 %v3446_v27, %s1901_s28 }
 0x394   :  { %1633 = vrot.lane.b32.xlu0 %v3265_v26, %s1903_s30 }
 0x395   :  { %v1554_v6 = vpop.permute.xlu2 %1553 }
 0x39b   :  { %1639 = vrot.lane.b32.xlu2 %v3278_v5, %s1903_s30  ;;  %1513 = vrot.lane.b32.xlu1 %v3455_v22, %s1901_s28 }
 0x39c   :  { %1635 = vrot.lane.b32.xlu0 %v3261_v43, %s1903_s30 }
 0x39d   :  { %v1484_v35 = vpop.permute.xlu1 %1483  ;;  %v1556_v1 = vpop.permute.xlu2 %1555 }
 0x39e   :  { %v1531_v26 = vadd.f32 %v1484_v35, %v3344_v60 }
 0x3a3   :  { %1577 = vrot.lane.b32.xlu1 %v3325_v47, %s1902_s29  ;;  %v1848_v47 = vld [vmem:[%s3580_s0 + $0x8] sm:$0xff] }
 0x3a4   :  { %1637 = vrot.lane.b32.xlu0 %v3210_v36, %s1903_s30 }
 0x3a5   :  { %v1548_v18 = vpop.permute.xlu1 %1547  ;;  %v1558_v8 = vpop.permute.xlu2 %1557 }
 0x3a6   :  { %v1488_v62 = vpop.permute.xlu0 %1487  ;;  %v1595_v5 = vadd.f32 %v1548_v18, %v1531_v26 }
 0x3a7   :  { %v1533_v43 = vadd.f32 %v1488_v62, %v3349_v48  ;;  %v1851_v62 = vld [vmem:[%s3580_s0 + $0x20] sm:$0xff] }
 0x3a8   :  { %v1659_v23 = vadd.f32 %v1612_v29, %v1595_v5 }
 0x3aa   :  { %v1691_v24 = vsub.f32 %v1659_v23, %v1675_v42 }
 0x3ac   :  { %1641 = vrot.lane.b32.xlu0 %v3274_v38, %s1903_s30  ;;  %v1676_v38 = vmul.f32 121.0, %v1848_v47  ;;  %v1749_v40 = vmul.f32 %v1691_v24, %v1691_v24  ;;  %v1708_v0 = vsel %vm1707_vm14, %v1691_v24, 0.0 }
 0x3ad   :  { %v1552_v17 = vpop.permute.xlu1 %1551  ;;  %v3479_v20 = vpop.permute.xlu2 %1559 }
 0x3ae   :  { %v1490_v53 = vpop.permute.xlu0 %1489  ;;  %v1597_v25 = vadd.f32 %v1552_v17, %v1533_v43  ;;  %v1765_v48 = vsel %vm1707_vm14, %v1749_v40, 0.0 }
 0x3af   :  { %v1534_v36 = vadd.f32 %v1490_v53, %v3356_v14  ;;  %v1849_v14 = vld [vmem:[%s3580_s0 + $0x10] sm:$0xff] }
 0x3b0   :  { %v1677_v16 = vmul.f32 121.0, %v1849_v14 }
 0x3b1   :  { %v1598_v33 = vadd.f32 %v1554_v6, %v1534_v36 }
 0x3b5   :  { %v1492_v7 = vpop.permute.xlu1 %1491  ;;  %v1562_v11 = vpop.permute.xlu2 %1561 }
 0x3b6   :  { %v1614_v12 = vpop.permute.xlu0 %1613  ;;  %v1535_v4 = vadd.f32 %v1492_v7, %v3363_v30 }
 0x3b7   :  { %v1660_v63 = vadd.f32 %v1614_v12, %v1596_v31 }
 0x3b8   :  { %v1599_v59 = vadd.f32 %v1556_v1, %v1535_v4  ;;  %v1679_v1 = vmul.f32 121.0, %v1851_v62 }
 0x3b9   :  { %v1692_v51 = vsub.f32 %v1660_v63, %v1676_v38  ;;  %v1852_v38 = vld [vmem:[%s3580_s0 + $0x28] sm:$0xff] }
 0x3ba   :  { %v1680_v7 = vmul.f32 121.0, %v1852_v38 }
 0x3bb   :  { %v1709_v15 = vsel %vm1707_vm14, %v1692_v51, 0.0  ;;  %v1750_v60 = vmul.f32 %v1692_v51, %v1692_v51 }
 0x3bc   :  { %v1710_v55 = vadd.f32 %v1709_v15, %v1708_v0 }
 0x3bd   :  { %v1766_v52 = vsel %vm1707_vm14, %v1750_v60, 0.0  ;;  %v1494_v45 = vpop.permute.xlu1 %1493  ;;  %v1564_v17 = vpop.permute.xlu2 %1563 }
 0x3be   :  { %v1767_v30 = vadd.f32 %v1766_v52, %v1765_v48  ;;  %v1616_v44 = vpop.permute.xlu0 %1615 }
 0x3bf   :  { %v1661_v50 = vadd.f32 %v1616_v44, %v1597_v25  ;;  %v1536_v25 = vadd.f32 %v1494_v45, %v3371_v41 }
 0x3c1   :  { %v1693_v58 = vsub.f32 %v1661_v50, %v1677_v16  ;;  %v1600_v47 = vadd.f32 %v1558_v8, %v1536_v25 }
 0x3c3   :  { %v1711_v3 = vsel %vm1707_vm14, %v1693_v58, 0.0  ;;  %v1751_v9 = vmul.f32 %v1693_v58, %v1693_v58 }
 0x3c4   :  { %v1712_v32 = vadd.f32 %v1711_v3, %v1710_v55 }
 0x3c5   :  { %v1768_v2 = vsel %vm1707_vm14, %v1751_v9, 0.0  ;;  %v1496_v31 = vpop.permute.xlu1 %1495  ;;  %v1566_v51 = vpop.permute.xlu2 %1565 }
 0x3c6   :  { %v1769_v54 = vadd.f32 %v1768_v2, %v1767_v30  ;;  %v1618_v21 = vpop.permute.xlu0 %1617  ;;  %v1537_v9 = vadd.f32 %v1496_v31, %v3378_v37  ;;  %v1854_v37 = vld [vmem:[%s3580_s0 + $0x38] sm:$0xff] }
 0x3c7   :  { %v1662_v29 = vadd.f32 %v1618_v21, %v1598_v33 }
 0x3c9   :  { %v1694_v56 = vsub.f32 %v1662_v29, %v1678_v61  ;;  %v1601_v61 = vadd.f32 %v3479_v20, %v1537_v9  ;;  %v1853_v29 = vld [vmem:[%s3580_s0 + $0x30] sm:$0xff] }
 0x3cb   :  { %v1713_v6 = vsel %vm1707_vm14, %v1694_v56, 0.0  ;;  %v1752_v35 = vmul.f32 %v1694_v56, %v1694_v56  ;;  %v1681_v56 = vmul.f32 121.0, %v1853_v29 }
 0x3cc   :  { %v1714_v26 = vadd.f32 %v1713_v6, %v1712_v32 }
 0x3cd   :  { %v1770_v18 = vsel %vm1707_vm14, %v1752_v35, 0.0  ;;  %v1498_v23 = vpop.permute.xlu1 %1497  ;;  %v1568_v52 = vpop.permute.xlu2 %1567 }
 0x3ce   :  { %v1771_v5 = vadd.f32 %v1770_v18, %v1769_v54  ;;  %v1620_v43 = vpop.permute.xlu0 %1619  ;;  %v1538_v32 = vadd.f32 %v1498_v23, %v3386_v34  ;;  %v1682_v34 = vmul.f32 121.0, %v1854_v37 }
 0x3cf   :  { %v1663_v53 = vadd.f32 %v1620_v43, %v1599_v59 }
 0x3d0   :  { %v1602_v35 = vadd.f32 %v1562_v11, %v1538_v32  ;;  %v1855_v11 = vld [vmem:[%s3580_s0 + $0x40] sm:$0xff] }
 0x3d1   :  { %v1695_v36 = vsub.f32 %v1663_v53, %v1679_v1  ;;  %v1683_v23 = vmul.f32 121.0, %v1855_v11 }
 0x3d3   :  { %v1715_v28 = vsel %vm1707_vm14, %v1695_v36, 0.0  ;;  %v1753_v42 = vmul.f32 %v1695_v36, %v1695_v36 }
 0x3d4   :  { %v1716_v33 = vadd.f32 %v1715_v28, %v1714_v26 }
 0x3d5   :  { %v1772_v24 = vsel %vm1707_vm14, %v1753_v42, 0.0  ;;  %v1500_v4 = vpop.permute.xlu1 %1499  ;;  %v1570_v30 = vpop.permute.xlu2 %1569 }
 0x3d6   :  { %v1773_v12 = vadd.f32 %v1772_v24, %v1771_v5  ;;  %v1622_v63 = vpop.permute.xlu0 %1621  ;;  %v1539_v54 = vadd.f32 %v1500_v4, %v3394_v57  ;;  %v1857_v24 = vld [vmem:[%s3580_s0 + $0x50] sm:$0xff] }
 0x3d7   :  { %v1664_v40 = vadd.f32 %v1622_v63, %v1600_v47  ;;  %v1685_v47 = vmul.f32 121.0, %v1857_v24  ;;  %v1858_v63 = vld [vmem:[%s3580_s0 + $0x58] sm:$0xff] }
 0x3d8   :  { %v1603_v57 = vadd.f32 %v1564_v17, %v1539_v54 }
 0x3d9   :  { %v1696_v59 = vsub.f32 %v1664_v40, %v1680_v7  ;;  %v1686_v40 = vmul.f32 121.0, %v1858_v63  ;;  %v1862_v63 = vld [vmem:[%s3580_s0 + $0x78] sm:$0xff] }
 0x3db   :  { %v1717_v41 = vsel %vm1707_vm14, %v1696_v59, 0.0  ;;  %v1754_v0 = vmul.f32 %v1696_v59, %v1696_v59 }
 0x3dc   :  { %v3505_v15 = vadd.f32 %v1717_v41, %v1716_v33 }
 0x3dd   :  { %v1774_v60 = vsel %vm1707_vm14, %v1754_v0, 0.0  ;;  %v1502_v8 = vpop.permute.xlu1 %1501  ;;  %v1572_v3 = vpop.permute.xlu2 %1571 }
 0x3de   :  { %v3508_v55 = vadd.f32 %v1774_v60, %v1773_v12  ;;  %v1624_v48 = vpop.permute.xlu0 %1623  ;;  %v1540_v26 = vadd.f32 %v1502_v8, %v3402_v10 }
 0x3df   :  { %v1665_v6 = vadd.f32 %v1624_v48, %v1601_v61 }
 0x3e0   :  { %v1604_v43 = vadd.f32 %v1566_v51, %v1540_v26  ;;  %v1860_v26 = vld [vmem:[%s3580_s0 + $0x68] sm:$0xff] }
 0x3e1   :  { %v1697_v18 = vsub.f32 %v1665_v6, %v1681_v56  ;;  %v1688_v37 = vmul.f32 121.0, %v1860_v26 }
 0x3e3   :  { %v1755_v42 = vmul.f32 %v1697_v18, %v1697_v18  ;;  %v1719_v12 = vsel %vm1707_vm14, %v1697_v18, 0.0  ;;  %v1861_v18 = vld [vmem:[%s3580_s0 + $0x70] sm:$0xff] }
 0x3e5   :  { %v1504_v14 = vpop.permute.xlu1 %1503  ;;  %v3514_v21 = vpop.permute.xlu2 %1573  ;;  %v1776_v41 = vsel %vm1707_vm14, %v1755_v42, 0.0 }
 0x3e6   :  { %v1626_v16 = vpop.permute.xlu0 %1625  ;;  %v1541_v20 = vadd.f32 %v1504_v14, %v3411_v39  ;;  %v1856_v39 = vld [vmem:[%s3580_s0 + $0x48] sm:$0xff]  ;;  %v1859_v14 = vld [vmem:[%s3580_s0 + $0x60] sm:$0xff]  ;;  %v1777_v32 = vadd.f32 %v1776_v41, %v3508_v55  ;;  %s1904_s0 = smov [#allocation2]  }
 0x3e7   :  { %v1666_v31 = vadd.f32 %v1626_v16, %v1602_v35  ;;  %v1684_v17 = vmul.f32 121.0, %v1856_v39  ;;  %v1687_v16 = vmul.f32 121.0, %v1859_v14  ;;  %s1816_s7 = sshll.u32 %s1904_s0, 4  ;;  %s1817_s7 = int_to_ptr.vmem [resolvable:$true] %s1816_s7 }
 0x3e8   :  { %v1605_v28 = vadd.f32 %v1568_v52, %v1541_v20 }
 0x3e9   :  { %v1698_v53 = vsub.f32 %v1666_v31, %v1682_v34 }
 0x3eb   :  { %v1721_v0 = vsel %vm1707_vm14, %v1698_v53, 0.0 }
 0x3ed   :  { %v1506_v45 = vpop.permute.xlu1 %1505 }
 0x3ee   :  { %v1628_v44 = vpop.permute.xlu0 %1627  ;;  %v1542_v5 = vadd.f32 %v1506_v45, %v3419_v13  ;;  %v1576_v13 = vpop.permute.xlu2 %1575  ;;  %v1720_v45 = vadd.f32 %v1719_v12, %v3505_v15 }
 0x3ef   :  { %v1667_v10 = vadd.f32 %v1628_v44, %v1603_v57 }
 0x3f0   :  { %v1606_v7 = vadd.f32 %v1570_v30, %v1542_v5 }
 0x3f1   :  { %v1699_v33 = vsub.f32 %v1667_v10, %v1683_v23 }
 0x3f3   :  { %v1757_v48 = vmul.f32 %v1699_v33, %v1699_v33 }
 0x3f5   :  { %v1508_v50 = vpop.permute.xlu1 %1507  ;;  %v1780_v54 = vsel %vm1707_vm14, %v1757_v48, 0.0 }
 0x3f6   :  { %v1630_v58 = vpop.permute.xlu0 %1629  ;;  %v1543_v25 = vadd.f32 %v1508_v50, %v3427_v46  ;;  %v1756_v46 = vmul.f32 %v1698_v53, %v1698_v53 }
 0x3f7   :  { %v1668_v36 = vadd.f32 %v1630_v58, %v1604_v43  ;;  %v1723_v58 = vsel %vm1707_vm14, %v1699_v33, 0.0 }
 0x3f8   :  { %v1607_v59 = vadd.f32 %v1572_v3, %v1543_v25  ;;  %v1778_v44 = vsel %vm1707_vm14, %v1756_v46, 0.0 }
 0x3f9   :  { %v1700_v4 = vsub.f32 %v1668_v36, %v1684_v17  ;;  %v1779_v15 = vadd.f32 %v1778_v44, %v1777_v32 }
 0x3fb   :  { %v1758_v3 = vmul.f32 %v1700_v4, %v1700_v4  ;;  %v1725_v29 = vsel %vm1707_vm14, %v1700_v4, 0.0  ;;  %v1781_v20 = vadd.f32 %v1780_v54, %v1779_v15 }
 0x3fd   :  { %v1510_v2 = vpop.permute.xlu1 %1509 }
 0x3fe   :  { %v1632_v19 = vpop.permute.xlu0 %1631  ;;  %v1544_v9 = vadd.f32 %v1510_v2, %v3437_v49  ;;  %v1782_v49 = vsel %vm1707_vm14, %v1758_v3, 0.0  ;;  %v1640_v2 = vpop.permute.xlu2 %1639 }
 0x3ff   :  { %v1669_v38 = vadd.f32 %v1632_v19, %v1605_v28  ;;  %v1722_v19 = vadd.f32 %v1721_v0, %v1720_v45  ;;  %v1783_v53 = vadd.f32 %v1782_v49, %v1781_v20 }
 0x400   :  { %v1608_v31 = vadd.f32 %v3514_v21, %v1544_v9 }
 0x401   :  { %v1701_v52 = vsub.f32 %v1669_v38, %v1685_v47  ;;  %v1724_v35 = vadd.f32 %v1723_v58, %v1722_v19 }
 0x403   :  { %v1759_v56 = vmul.f32 %v1701_v52, %v1701_v52  ;;  %v1727_v55 = vsel %vm1707_vm14, %v1701_v52, 0.0  ;;  %v1726_v57 = vadd.f32 %v1725_v29, %v1724_v35 }
 0x405   :  { %v1512_v62 = vpop.permute.xlu1 %1511  ;;  %v1784_v11 = vsel %vm1707_vm14, %v1759_v56, 0.0  ;;  %v1728_v25 = vadd.f32 %v1727_v55, %v1726_v57 }
 0x406   :  { %v1634_v1 = vpop.permute.xlu0 %1633  ;;  %v1545_v60 = vadd.f32 %v1512_v62, %v3446_v27  ;;  %v1689_v62 = vmul.f32 121.0, %v1861_v18  ;;  %v1785_v36 = vadd.f32 %v1784_v11, %v1783_v53 }
 0x407   :  { %v1670_v51 = vadd.f32 %v1634_v1, %v1606_v7 }
 0x408   :  { %v1609_v61 = vadd.f32 %v1576_v13, %v1545_v60 }
 0x409   :  { %v1702_v27 = vsub.f32 %v1670_v51, %v1686_v40  ;;  %v1690_v40 = vmul.f32 121.0, %v1862_v63 }
 0x40a   :  { %v1673_v1 = vadd.f32 %v1640_v2, %v1609_v61 }
 0x40b   :  { %v1760_v34 = vmul.f32 %v1702_v27, %v1702_v27  ;;  %v1729_v23 = vsel %vm1707_vm14, %v1702_v27, 0.0 }
 0x40c   :  { %v1705_v28 = vsub.f32 %v1673_v1, %v1689_v62  ;;  %v1730_v42 = vadd.f32 %v1729_v23, %v1728_v25 }
 0x40d   :  { %v1514_v50 = vpop.permute.xlu1 %1513  ;;  %v1786_v39 = vsel %vm1707_vm14, %v1760_v34, 0.0 }
 0x40e   :  { %v1636_v8 = vpop.permute.xlu0 %1635  ;;  %v1546_v13 = vadd.f32 %v1514_v50, %v3455_v22  ;;  %v1787_v7 = vadd.f32 %v1786_v39, %v1785_v36  ;;  %v1763_v0 = vmul.f32 %v1705_v28, %v1705_v28  ;;  %v1735_v48 = vsel %vm1707_vm14, %v1705_v28, 0.0 }
 0x40f   :  { %v1671_v30 = vadd.f32 %v1636_v8, %v1607_v59 }
 0x411   :  { %v1703_v6 = vsub.f32 %v1671_v30, %v1687_v16  ;;  %v1792_v30 = vsel %vm1707_vm14, %v1763_v0, 0.0 }
 0x413   :  { %v1761_v10 = vmul.f32 %v1703_v6, %v1703_v6  ;;  %v1731_v21 = vsel %vm1707_vm14, %v1703_v6, 0.0 }
 0x414   :  { %v1732_v12 = vadd.f32 %v1731_v21, %v1730_v42 }
 0x415   :  { %v1578_v33 = vpop.permute.xlu1 %1577  ;;  %v1788_v24 = vsel %vm1707_vm14, %v1761_v10, 0.0 }
 0x416   :  { %v1638_v5 = vpop.permute.xlu0 %1637  ;;  %v1610_v46 = vadd.f32 %v1578_v33, %v1546_v13  ;;  %v1789_v51 = vadd.f32 %v1788_v24, %v1787_v7 }
 0x417   :  { %v1672_v43 = vadd.f32 %v1638_v5, %v1608_v31 }
 0x419   :  { %v1704_v17 = vsub.f32 %v1672_v43, %v1688_v37 }
 0x41b   :  { %v1733_v47 = vsel %vm1707_vm14, %v1704_v17, 0.0  ;;  %v1762_v38 = vmul.f32 %v1704_v17, %v1704_v17 }
 0x41c   :  { %v1734_v59 = vadd.f32 %v1733_v47, %v1732_v12 }
 0x41d   :  { %v1790_v4 = vsel %vm1707_vm14, %v1762_v38, 0.0 }
 0x41e   :  { %v1642_v41 = vpop.permute.xlu0 %1641  ;;  %v1791_v60 = vadd.f32 %v1790_v4, %v1789_v51  ;;  %v1736_v52 = vadd.f32 %v1735_v48, %v1734_v59 }
 0x41f   :  { %v1674_v22 = vadd.f32 %v1642_v41, %v1610_v46 }
 0x420   :  { %v1793_v44 = vadd.f32 %v1792_v30, %v1791_v60 }
 0x421   :  { %v1706_v8 = vsub.f32 %v1674_v22, %v1690_v40 }
 0x423   :  { %v1737_v14 = vsel %vm1707_vm14, %v1706_v8, 0.0  ;;  %v1764_v16 = vmul.f32 %v1706_v8, %v1706_v8 }
 0x424   :  { %v1738_v45 = vadd.f32 %v1737_v14, %v1736_v52 }
 0x425   :  { %v1794_v50 = vsel %vm1707_vm14, %v1764_v16, 0.0 }
 0x426   :  { %1739 = vadd.xlane.f32.xlu1 %v1738_v45  ;;  %v1795_v58 = vadd.f32 %v1794_v50, %v1793_v44 }
 0x428   :  { %1796 = vadd.xlane.f32.xlu2 %v1795_v58 }
 0x499   :  { %v1740_v3 = vpop.xlane.xlu1 %1739 }
 0x49a   :  { %v1741_v9 = vrot.slane %v1740_v3, 4 }
 0x49b   :  { %v1797_v27 = vpop.xlane.xlu2 %1796 }
 0x49c   :  { %v1742_v32 = vadd.f32 %v1741_v9, %v1740_v3  ;;  %v1798_v19 = vrot.slane %v1797_v27, 4 }
 0x49e   :  { %v1743_v61 = vrot.slane %v1742_v32, 2  ;;  %v1799_v54 = vadd.f32 %v1798_v19, %v1797_v27 }
 0x4a0   :  { %v1800_v29 = vrot.slane %v1799_v54, 2  ;;  %v1744_v56 = vadd.f32 %v1743_v61, %v1742_v32 }
 0x4a2   :  { %v1801_v6 = vadd.f32 %v1800_v29, %v1799_v54  ;;  %v1745_v15 = vrot.slane %v1744_v56, 1 }
 0x4a4   :  { %v1746_v35 = vadd.f32 %v1745_v15, %v1744_v56  ;;  %v1802_v26 = vrot.slane %v1801_v6, 1 }
 0x4a6   :  { %1827 = vpush %v1746_v35  ;;  %v1803_v37 = vadd.f32 %v1802_v26, %v1801_v6 }
 0x4a8   :  { %1829 = vpush %v1803_v37 }
 0x4d7   :  { %s1828_s8 = spop %1827 }
 0x4d8   :  { %v1748_v49 = vstv %s1828_s8 }
 0x4d9   :  { %s1830_s12 = spop %1829 }
 0x4da   :  { %v1805_v2 = vstv %s1830_s12 }
 0x4db   :  { %v1806_v55 = vsel %vm1137_vm5, %v1748_v49, %v1805_v2 }
 0x4dc   :  { %1808 = vst.msk [vmem:[#allocation2] sm:$0x1] %vm1807_vm15, %v1806_v55 }
 0x4dd   :  { %1821 = dma.vmem_to_hbm [thread:$0]  %s1817_s7, 16, %s1819_s11, [#allocation3]  }
 0x4de   :  { %1887 = dma.done.wait [#allocation3], 16  }
 0x4df   :  { %1888 = vsyncadd [#allocation3], 4294967280 }
 0x4e0   :  { %1826 = vsyncpa [#allocation3], 1 }

</bundles_post_ra>
